<compile_context>
chip_gen: v7x
topology: tpu7x:2x2x1
jax: 0.10.0
libtpu: 0.0.40
codegen_flags: <defaults>
</compile_context>

<pallas_src>
import functools

import jax
import jax.numpy as jnp
from jax import lax
from jax.experimental import pallas as pl
from jax.experimental.pallas import tpu as pltpu

BN_EPS = 1e-5


def hardswish(x):
    return x * jnp.clip(x + 3.0, 0.0, 6.0) * (1.0 / 6.0)


def fold_bn(gamma, beta, mean, var):
    s = gamma / jnp.sqrt(var + BN_EPS)
    return s, beta - mean * s


# --------------------------------- fused kernel -------------------------------------
def _gasconv_kernel(x_ref, w1_ref, b1_ref, pmask_ref,
                    wd_ref, b2_ref, vmask_ref,
                    wc_ref, bc_ref, w3_ref, b3_ref,
                    o_ref, hs_ref, *, wh, lpad, bt, cp):
    # x_ref:  (1, Cin, 4*BT*L)  bf16: 4 stride-2 phases x BT images, spatial on lanes
    # w1_ref: (3*Cp, Cin) bf16  pointwise conv (BN1 scale folded per row, group-padded)
    # wd_ref: (3, 9, Cp, 1)     depthwise s2 taps (hardswish 1/6 and BN2 scale folded)
    # wc_ref: (3, 9, Cp, 1)     CCA depthwise taps;  bc_ref: (3, Cp, 1) CCA biases
    # w3_ref: (Cout, 3*Cp)      final pointwise (hardswish 1/6 and BN3 scale folded)
    # b*_ref: folded BatchNorm biases
    # pmask:  (1, 4*BT*L)  zero at original zero-pad positions and lane tails
    # vmask:  (1, BT*L)    one only on the valid Ho x Wo output grid of each image
    # hs_ref: (3*Cp, BT*L) VMEM scratch holding hs6(CCA out) for the merged final matmul
    L = lpad
    BL = bt * L                               # lanes per phase slab (all tile images)
    pmask = pmask_ref[...]
    vmask = vmask_ref[...]
    x = x_ref[0]                              # (Cin, 4*BL) bf16

    def hs6(v):                               # 6 * hardswish(v); 1/6 folded into wd / w3
        return v * jnp.clip(v + 3.0, 0.0, 6.0)

    def shifted(v, k):                        # v advanced by k along the flattened lanes
        if k == 0:
            return v
        return pltpu.roll(v, shift=(-k) % BL, axis=1)

    # ---- ONE merged 1x1 conv (+BN1 bias) + hardswish for all 3 groups / 4 phases ----
    y1 = jnp.dot(w1_ref[...], x, preferred_element_type=jnp.float32)   # (3Cp, 4BL) f32
    h = hs6(y1 + b1_ref[...]) * pmask

    pre = None
    for g in range(3):
        hg = h[g * cp:(g + 1) * cp]           # tile-aligned sublane slice (Cp, 4BL)
        h_ee = hg[:, 0 * BL:1 * BL]           # 128-aligned lane slices (no relayout)
        h_eo = hg[:, 1 * BL:2 * BL]
        h_oe = hg[:, 2 * BL:3 * BL]
        h_oo = hg[:, 3 * BL:4 * BL]

        # ---- depthwise 3x3 / stride 2 via phase decomposition (+BN2 bias) ----
        wd = wd_ref[g]
        z = (wd[0] * h_ee
             + wd[1] * h_eo
             + wd[2] * shifted(h_ee, 1)
             + wd[3] * h_oe
             + wd[4] * h_oo
             + wd[5] * shifted(h_oe, 1)
             + wd[6] * shifted(h_ee, wh)
             + wd[7] * shifted(h_eo, wh)
             + wd[8] * shifted(h_ee, wh + 1))
        u = (z + b2_ref[g]) * vmask                                    # (Cp, BL)

        # ---- CCA: chained depthwise 3x3 stride-1 pad-1 conv with bias ----
        if pre is not None:
            u = u + pre
        wc = wc_ref[g]
        acc = wc[4] * u                       # centre tap first (no zero init)
        for di in (-1, 0, 1):
            for dj in (-1, 0, 1):
                if di == 0 and dj == 0:
                    continue
                acc = acc + wc[3 * (di + 1) + (dj + 1)] * shifted(u, di * wh + dj)
        cg = (acc + bc_ref[g]) * vmask
        pre = cg

        # hardswish(cg)*6 stashed for the single merged output matmul
        hs_ref[g * cp:(g + 1) * cp, :] = hs6(cg)

    # ---- ONE merged final 1x1 conv (+BN3 bias), then per-image lane-dense stores ----
    y3 = jnp.dot(w3_ref[...], hs_ref[...],
                 preferred_element_type=jnp.float32) + b3_ref[...]     # (Cout, BL)
    for b in range(bt):
        o_ref[b] = y3[:, b * L:(b + 1) * L]


# ----------------------------------- wrapper ----------------------------------------
def gasconv_forward(x_nchw, p):
    N, Cin, H, W = x_nchw.shape
    assert H % 2 == 0 and W % 2 == 0, "stride-2 phase decomposition assumes even H, W"
    C = Cin
    Cout = p['w3'].shape[1]
    Cp = ((C + 7) // 8) * 8                  # per-group channels, padded to f32 sublane tile
    padc = Cp - C
    Ho, Wo = H // 2, W // 2
    Hh, Wh = Ho + 1, Wo + 1                  # phase-grid size of the zero-padded input
    HW = Hh * Wh
    # pad the flattened per-image spatial axis to a lane multiple, keeping >= Wh+1 zero
    # tail so conv taps that roll across image boundaries only ever read zeros.
    L = ((HW + Wh + 1 + 127) // 128) * 128

    # ---- batch tiling: pack BT images into the lane axis of one grid step ----
    per_img_bytes = 4 * L * (20 * Cp + Cout) + 8 * L * Cin   # rough f32 working set
    BT = max(1, min(N, (6 << 20) // max(per_img_bytes, 1)))
    while N % BT:
        BT -= 1
    NB = N // BT
    BL = BT * L

    # ---- space-to-depth (bf16): the 4 stride-2 phases of the zero-padded input ----
    xb = x_nchw.astype(jnp.bfloat16)
    xp = jnp.pad(xb, ((0, 0), (0, 0), (1, 1), (1, 1)))          # (N, Cin, H+2, W+2)
    xp = xp.reshape(N, Cin, Hh, 2, Wh, 2)
    xp = jnp.transpose(xp, (0, 1, 3, 5, 2, 4))                  # (N, Cin, 2, 2, Hh, Wh)
    xp = xp.reshape(N, Cin, 4, HW)
    xp = jnp.pad(xp, ((0, 0), (0, 0), (0, 0), (0, L - HW)))     # (N, Cin, 4, L)
    xp = xp.reshape(NB, BT, Cin, 4, L).transpose(0, 2, 3, 1, 4)  # (NB, Cin, 4, BT, L)
    xph = xp.reshape(NB, Cin, 4 * BL)

    # ---- masks (lane order: phase, image-in-tile, L) ----
    hh = jnp.arange(Hh)
    ww = jnp.arange(Wh)
    pm_ph = []
    for a in range(2):
        for b in range(2):
            rok = (2 * hh + a >= 1) & (2 * hh + a <= H)
            cok = (2 * ww + b >= 1) & (2 * ww + b <= W)
            m = (rok[:, None] & cok[None, :]).astype(jnp.float32).reshape(HW)
            pm_ph.append(jnp.pad(m, (0, L - HW)))
    pm = jnp.stack(pm_ph)                                       # (4, L)
    pmask = jnp.broadcast_to(pm[:, None, :], (4, BT, L)).reshape(1, 4 * BL)
    vm = ((hh < Ho)[:, None] & (ww < Wo)[None, :]).astype(jnp.float32).reshape(HW)
    vm = jnp.pad(vm, (0, L - HW))
    vmask = jnp.broadcast_to(vm[None, :], (BT, L)).reshape(1, BL)

    # ---- fold BN stats and hardswish 1/6 into the adjacent linear weights ----
    s1, b1 = fold_bn(p['g1'], p['beta1'], p['m1'], p['v1'])
    s2, b2 = fold_bn(p['g2'], p['beta2'], p['m2'], p['v2'])
    s3, b3 = fold_bn(p['g3'], p['beta3'], p['m3'], p['v3'])

    w1_oi = (p['w1'].T * s1[:, None]).reshape(3, C, Cin)                  # BN1 scale folded
    w1g = jnp.pad(w1_oi, ((0, 0), (0, padc), (0, 0))).reshape(3 * Cp, Cin).astype(jnp.bfloat16)
    b1g = jnp.pad(b1.reshape(3, C), ((0, 0), (0, padc))).reshape(3 * Cp, 1)

    wd = (p['wd'].reshape(9, 3 * C) * (s2 / 6.0)[None, :])                # 1/6 + BN2 folded
    wd = wd.reshape(9, 3, C).transpose(1, 0, 2)
    wdg = jnp.pad(wd, ((0, 0), (0, 0), (0, padc)))[..., None]             # (3, 9, Cp, 1)
    b2g = jnp.pad(b2.reshape(3, C), ((0, 0), (0, padc)))[..., None]       # (3, Cp, 1)

    wcg = jnp.pad(p['wc'].reshape(3, 9, C), ((0, 0), (0, 0), (0, padc)))[..., None]
    bcg = jnp.pad(p['bc'], ((0, 0), (0, padc)))[..., None]                # (3, Cp, 1)

    w3_oi = (p['w3'].T * (s3[:, None] / 6.0)).reshape(Cout, 3, C)         # 1/6 + BN3 folded
    w3g = jnp.pad(w3_oi, ((0, 0), (0, 0), (0, padc))).reshape(Cout, 3 * Cp)
    b3g = b3.reshape(Cout, 1)

    grid_spec = pltpu.PrefetchScalarGridSpec(
        num_scalar_prefetch=0,
        grid=(NB,),
        in_specs=[
            pl.BlockSpec((1, Cin, 4 * BL), lambda n: (n, 0, 0)),     # x phases (bf16)
            pl.BlockSpec((3 * Cp, Cin), lambda n: (0, 0)),           # w1 (merged groups)
            pl.BlockSpec((3 * Cp, 1), lambda n: (0, 0)),             # BN1 bias
            pl.BlockSpec((1, 4 * BL), lambda n: (0, 0)),             # pad mask
            pl.BlockSpec((3, 9, Cp, 1), lambda n: (0, 0, 0, 0)),     # dw-s2 weights
            pl.BlockSpec((3, Cp, 1), lambda n: (0, 0, 0)),           # BN2 bias
            pl.BlockSpec((1, BL), lambda n: (0, 0)),                 # valid-output mask
            pl.BlockSpec((3, 9, Cp, 1), lambda n: (0, 0, 0, 0)),     # CCA weights
            pl.BlockSpec((3, Cp, 1), lambda n: (0, 0, 0)),           # CCA bias
            pl.BlockSpec((Cout, 3 * Cp), lambda n: (0, 0)),          # w3 (merged groups)
            pl.BlockSpec((Cout, 1), lambda n: (0, 0)),               # BN3 bias
        ],
        out_specs=pl.BlockSpec((BT, Cout, L), lambda n: (n, 0, 0)),
        scratch_shapes=[pltpu.VMEM((3 * Cp, BL), jnp.float32)],
    )

    cost = pl.CostEstimate(
        flops=int(2 * (Cin * 4 + Cout) * 3 * Cp * L * N          # two merged 1x1 matmuls
                  + (2 * 9 + 2 * 9 + 20) * 3 * Cp * L * N),      # depthwise + elementwise
        transcendentals=0,
        bytes_accessed=int(xph.size * 2 + N * Cout * L * 4
                           + (w1g.size * 2) + 4 * (w3g.size + wdg.size + wcg.size)),
    )

    out = pl.pallas_call(
        functools.partial(_gasconv_kernel, wh=Wh, lpad=L, bt=BT, cp=Cp),
        out_shape=jax.ShapeDtypeStruct((N, Cout, L), jnp.float32),
        grid_spec=grid_spec,
        compiler_params=pltpu.CompilerParams(
            dimension_semantics=("parallel",),
            vmem_limit_bytes=32 * 1024 * 1024),
        cost_estimate=cost,
    )(xph, w1g, b1g, pmask, wdg, b2g, vmask, wcg, bcg, w3g, b3g)

    # drop lane padding / phase-grid border -> NCHW directly (no transpose needed)
    out = out[:, :, :HW].reshape(N, Cout, Hh, Wh)[:, :, :Ho, :Wo]
    return out


# --------------------------- deterministic parameter init ---------------------------
def init_params(key, Cin, Cout):
    C3 = 3 * Cin
    k = jax.random.split(key, 17)

    def u(kk, shape, scale):
        return (jax.random.uniform(kk, shape, jnp.float32) - 0.5) * 2.0 * scale

    return {
        'w1': u(k[0], (Cin, C3), 0.5),
        'g1': 1.0 + u(k[1], (C3,), 0.2), 'beta1': u(k[2], (C3,), 0.2),
        'm1': u(k[3], (C3,), 0.2), 'v1': 1.0 + u(k[4], (C3,), 0.4),
        'wd': u(k[5], (3, 3, C3), 0.5),
        'g2': 1.0 + u(k[6], (C3,), 0.2), 'beta2': u(k[7], (C3,), 0.2),
        'm2': u(k[8], (C3,), 0.2), 'v2': 1.0 + u(k[9], (C3,), 0.4),
        'wc': u(k[10], (3, 3, 3, Cin), 0.5), 'bc': u(k[11], (3, Cin), 0.2),
        'w3': u(k[12], (C3, Cout), 0.5),
        'g3': 1.0 + u(k[13], (Cout,), 0.2), 'beta3': u(k[14], (Cout,), 0.2),
        'm3': u(k[15], (Cout,), 0.2), 'v3': 1.0 + u(k[16], (Cout,), 0.4),
    }


# ------------------------------ pure-JAX reference ----------------------------------
def reference_forward(x_nchw, p):
    C3 = p['w1'].shape[1]
    Cin = p['w1'].shape[0]

    def bn(x, g, b, m, v):
        return ((x - m[None, :, None, None]) / jnp.sqrt(v + BN_EPS)[None, :, None, None]
                * g[None, :, None, None] + b[None, :, None, None])

    def conv(x, w, stride, pad, groups):
        return lax.conv_general_dilated(
            x, w, (stride, stride), ((pad, pad), (pad, pad)),
            feature_group_count=groups,
            dimension_numbers=('NCHW', 'OIHW', 'NCHW'),
            precision=lax.Precision.HIGHEST)

    y = conv(x_nchw, jnp.transpose(p['w1'], (1, 0))[:, :, None, None], 1, 0, 1)
    y = hardswish(bn(y, p['g1'], p['beta1'], p['m1'], p['v1']))
    y = conv(y, jnp.transpose(p['wd'], (2, 0, 1))[:, None, :, :], 2, 1, C3)
    y = bn(y, p['g2'], p['beta2'], p['m2'], p['v2'])
    # CCA
    splits = jnp.split(y, 3, axis=1)
    outs, pre = [], None
    for g in range(3):
        wg = jnp.transpose(p['wc'][g], (2, 0, 1))[:, None, :, :]
        inp = splits[g] if g == 0 else splits[g] + pre
        og = conv(inp, wg, 1, 1, Cin) + p['bc'][g][None, :, None, None]
        outs.append(og)
        pre = og
    y = hardswish(jnp.concatenate(outs, axis=1))
    y = conv(y, jnp.transpose(p['w3'], (1, 0))[:, :, None, None], 1, 0, 1)
    y = bn(y, p['g3'], p['beta3'], p['m3'], p['v3'])
    return y


if __name__ == "__main__":
    key = jax.random.PRNGKey(0)
    kx, kp = jax.random.split(key)
    N, Cin, H, W, Cout = 2, 4, 16, 16, 8

    x = jax.random.normal(kx, (N, Cin, H, W), jnp.float32)
    params = init_params(kp, Cin, Cout)

    fwd = jax.jit(gasconv_forward)
    out = jax.block_until_ready(fwd(x, params))

    ref = reference_forward(x, params)
    err = float(jnp.max(jnp.abs(out - ref)))
    assert out.shape == ref.shape, (out.shape, ref.shape)
    # Matmuls run at default (bf16 MXU) precision on a bf16 input path and feed two
    # hardswish quadratics, so compare with a bf16-class tolerance.
    assert jnp.allclose(out, ref, atol=5e-2, rtol=2e-2), f"max abs err {err}"
    print("KERNEL_OK")
</pallas_src>

<mosaic_0001>
module attributes {stable_mosaic.version = 11 : i64} {
  func.func @_gasconv_kernel(%arg0: i32, %arg1: memref<1x4x1024xbf16, #tpu.memory_space<vmem>>, %arg2: memref<24x4xbf16, #tpu.memory_space<vmem>>, %arg3: memref<24x1xf32, #tpu.memory_space<vmem>>, %arg4: memref<1x1024xf32, #tpu.memory_space<vmem>>, %arg5: memref<3x9x8x1xf32, #tpu.memory_space<vmem>>, %arg6: memref<3x8x1xf32, #tpu.memory_space<vmem>>, %arg7: memref<1x256xf32, #tpu.memory_space<vmem>>, %arg8: memref<3x9x8x1xf32, #tpu.memory_space<vmem>>, %arg9: memref<3x8x1xf32, #tpu.memory_space<vmem>>, %arg10: memref<8x24xf32, #tpu.memory_space<vmem>>, %arg11: memref<8x1xf32, #tpu.memory_space<vmem>>, %arg12: memref<2x8x128xf32, #tpu.memory_space<vmem>>, %arg13: memref<24x256xf32, #tpu.memory_space<vmem>>) attributes {dimension_semantics = [#tpu.dimension_semantics<parallel>], iteration_bounds = array<i64: 1>, scalar_prefetch = 0 : i64, scratch_operands = 1 : i64, tpu.core_type = #tpu.core_type<tc>, window_params = [{transform_indices = @transform_0, window_bounds = array<i64: 1, 4, 1024>}, {pipeline_mode = #tpu.pipeline_mode<synchronous>, transform_indices = @transform_1, window_bounds = array<i64: 24, 4>}, {pipeline_mode = #tpu.pipeline_mode<synchronous>, transform_indices = @transform_2, window_bounds = array<i64: 24, 1>}, {pipeline_mode = #tpu.pipeline_mode<synchronous>, transform_indices = @transform_3, window_bounds = array<i64: 1, 1024>}, {pipeline_mode = #tpu.pipeline_mode<synchronous>, transform_indices = @transform_4, window_bounds = array<i64: 3, 9, 8, 1>}, {pipeline_mode = #tpu.pipeline_mode<synchronous>, transform_indices = @transform_5, window_bounds = array<i64: 3, 8, 1>}, {pipeline_mode = #tpu.pipeline_mode<synchronous>, transform_indices = @transform_6, window_bounds = array<i64: 1, 256>}, {pipeline_mode = #tpu.pipeline_mode<synchronous>, transform_indices = @transform_7, window_bounds = array<i64: 3, 9, 8, 1>}, {pipeline_mode = #tpu.pipeline_mode<synchronous>, transform_indices = @transform_8, window_bounds = array<i64: 3, 8, 1>}, {pipeline_mode = #tpu.pipeline_mode<synchronous>, transform_indices = @transform_9, window_bounds = array<i64: 8, 24>}, {pipeline_mode = #tpu.pipeline_mode<synchronous>, transform_indices = @transform_10, window_bounds = array<i64: 8, 1>}, {transform_indices = @transform_11, window_bounds = array<i64: 2, 8, 128>}]} {
    %c0 = arith.constant 0 : index
    %c0_0 = arith.constant 0 : index
    %0 = vector.load %arg4[%c0, %c0_0] : memref<1x1024xf32, #tpu.memory_space<vmem>>, vector<1x1024xf32>
    %c0_1 = arith.constant 0 : index
    %c0_2 = arith.constant 0 : index
    %1 = vector.load %arg7[%c0_1, %c0_2] : memref<1x256xf32, #tpu.memory_space<vmem>>, vector<1x256xf32>
    %c0_3 = arith.constant 0 : index
    %c0_4 = arith.constant 0 : index
    %c0_5 = arith.constant 0 : index
    %2 = vector.load %arg1[%c0_3, %c0_4, %c0_5] : memref<1x4x1024xbf16, #tpu.memory_space<vmem>>, vector<1x4x1024xbf16>
    %3 = vector.shape_cast %2 : vector<1x4x1024xbf16> to vector<4x1024xbf16>
    %c0_6 = arith.constant 0 : index
    %c0_7 = arith.constant 0 : index
    %4 = vector.load %arg2[%c0_6, %c0_7] : memref<24x4xbf16, #tpu.memory_space<vmem>>, vector<24x4xbf16>
    %cst = arith.constant dense<0.000000e+00> : vector<24x1024xf32>
    %5 = tpu.matmul %4, %3, %cst {dimension_numbers = #tpu.dot_dimension_numbers<[1], [0], [0], [1], [0, 0, 1, 1], [], []>} : vector<24x4xbf16>, vector<4x1024xbf16>, vector<24x1024xf32> -> vector<24x1024xf32>
    %c0_8 = arith.constant 0 : index
    %c0_9 = arith.constant 0 : index
    %6 = vector.load %arg3[%c0_8, %c0_9] : memref<24x1xf32, #tpu.memory_space<vmem>>, vector<24x1xf32>
    %7 = vector.broadcast %6 : vector<24x1xf32> to vector<24x1024xf32>
    %8 = arith.addf %5, %7 : vector<24x1024xf32>
    %cst_10 = arith.constant 3.000000e+00 : f32
    %9 = vector.broadcast %cst_10 : f32 to vector<24x1024xf32>
    %10 = arith.addf %8, %9 : vector<24x1024xf32>
    %cst_11 = arith.constant 0.000000e+00 : f32
    %cst_12 = arith.constant 6.000000e+00 : f32
    %11 = vector.broadcast %cst_11 : f32 to vector<24x1024xf32>
    %12 = arith.maximumf %11, %10 : vector<24x1024xf32>
    %13 = vector.broadcast %cst_12 : f32 to vector<24x1024xf32>
    %14 = arith.minimumf %13, %12 : vector<24x1024xf32>
    %15 = arith.mulf %8, %14 : vector<24x1024xf32>
    %16 = vector.broadcast %0 : vector<1x1024xf32> to vector<24x1024xf32>
    %17 = arith.mulf %15, %16 : vector<24x1024xf32>
    %18 = vector.extract_strided_slice %17 {offsets = [0, 0], sizes = [8, 1024], strides = [1, 1]} : vector<24x1024xf32> to vector<8x1024xf32>
    %19 = vector.extract_strided_slice %18 {offsets = [0, 0], sizes = [8, 256], strides = [1, 1]} : vector<8x1024xf32> to vector<8x256xf32>
    %20 = vector.extract_strided_slice %18 {offsets = [0, 256], sizes = [8, 256], strides = [1, 1]} : vector<8x1024xf32> to vector<8x256xf32>
    %21 = vector.extract_strided_slice %18 {offsets = [0, 512], sizes = [8, 256], strides = [1, 1]} : vector<8x1024xf32> to vector<8x256xf32>
    %22 = vector.extract_strided_slice %18 {offsets = [0, 768], sizes = [8, 256], strides = [1, 1]} : vector<8x1024xf32> to vector<8x256xf32>
    %c0_13 = arith.constant 0 : index
    %c0_14 = arith.constant 0 : index
    %c0_15 = arith.constant 0 : index
    %c0_16 = arith.constant 0 : index
    %23 = vector.load %arg5[%c0_13, %c0_14, %c0_15, %c0_16] : memref<3x9x8x1xf32, #tpu.memory_space<vmem>>, vector<1x9x8x1xf32>
    %24 = vector.shape_cast %23 : vector<1x9x8x1xf32> to vector<9x8x1xf32>
    %25 = vector.extract_strided_slice %24 {offsets = [0, 0, 0], sizes = [1, 8, 1], strides = [1, 1, 1]} : vector<9x8x1xf32> to vector<1x8x1xf32>
    %26 = vector.shape_cast %25 : vector<1x8x1xf32> to vector<8x1xf32>
    %27 = vector.broadcast %26 : vector<8x1xf32> to vector<8x256xf32>
    %28 = arith.mulf %27, %19 : vector<8x256xf32>
    %29 = vector.extract_strided_slice %24 {offsets = [1, 0, 0], sizes = [1, 8, 1], strides = [1, 1, 1]} : vector<9x8x1xf32> to vector<1x8x1xf32>
    %30 = vector.shape_cast %29 : vector<1x8x1xf32> to vector<8x1xf32>
    %31 = vector.broadcast %30 : vector<8x1xf32> to vector<8x256xf32>
    %32 = arith.mulf %31, %20 : vector<8x256xf32>
    %33 = arith.addf %28, %32 : vector<8x256xf32>
    %34 = vector.extract_strided_slice %24 {offsets = [2, 0, 0], sizes = [1, 8, 1], strides = [1, 1, 1]} : vector<9x8x1xf32> to vector<1x8x1xf32>
    %35 = vector.shape_cast %34 : vector<1x8x1xf32> to vector<8x1xf32>
    %c255_i32 = arith.constant 255 : i32
    %36 = tpu.dynamic_rotate %19 by %c255_i32 dim 1 : vector<8x256xf32>, i32 -> vector<8x256xf32>
    %37 = vector.broadcast %35 : vector<8x1xf32> to vector<8x256xf32>
    %38 = arith.mulf %37, %36 : vector<8x256xf32>
    %39 = arith.addf %33, %38 : vector<8x256xf32>
    %40 = vector.extract_strided_slice %24 {offsets = [3, 0, 0], sizes = [1, 8, 1], strides = [1, 1, 1]} : vector<9x8x1xf32> to vector<1x8x1xf32>
    %41 = vector.shape_cast %40 : vector<1x8x1xf32> to vector<8x1xf32>
    %42 = vector.broadcast %41 : vector<8x1xf32> to vector<8x256xf32>
    %43 = arith.mulf %42, %21 : vector<8x256xf32>
    %44 = arith.addf %39, %43 : vector<8x256xf32>
    %45 = vector.extract_strided_slice %24 {offsets = [4, 0, 0], sizes = [1, 8, 1], strides = [1, 1, 1]} : vector<9x8x1xf32> to vector<1x8x1xf32>
    %46 = vector.shape_cast %45 : vector<1x8x1xf32> to vector<8x1xf32>
    %47 = vector.broadcast %46 : vector<8x1xf32> to vector<8x256xf32>
    %48 = arith.mulf %47, %22 : vector<8x256xf32>
    %49 = arith.addf %44, %48 : vector<8x256xf32>
    %50 = vector.extract_strided_slice %24 {offsets = [5, 0, 0], sizes = [1, 8, 1], strides = [1, 1, 1]} : vector<9x8x1xf32> to vector<1x8x1xf32>
    %51 = vector.shape_cast %50 : vector<1x8x1xf32> to vector<8x1xf32>
    %c255_i32_17 = arith.constant 255 : i32
    %52 = tpu.dynamic_rotate %21 by %c255_i32_17 dim 1 : vector<8x256xf32>, i32 -> vector<8x256xf32>
    %53 = vector.broadcast %51 : vector<8x1xf32> to vector<8x256xf32>
    %54 = arith.mulf %53, %52 : vector<8x256xf32>
    %55 = arith.addf %49, %54 : vector<8x256xf32>
    %56 = vector.extract_strided_slice %24 {offsets = [6, 0, 0], sizes = [1, 8, 1], strides = [1, 1, 1]} : vector<9x8x1xf32> to vector<1x8x1xf32>
    %57 = vector.shape_cast %56 : vector<1x8x1xf32> to vector<8x1xf32>
    %c247_i32 = arith.constant 247 : i32
    %58 = tpu.dynamic_rotate %19 by %c247_i32 dim 1 : vector<8x256xf32>, i32 -> vector<8x256xf32>
    %59 = vector.broadcast %57 : vector<8x1xf32> to vector<8x256xf32>
    %60 = arith.mulf %59, %58 : vector<8x256xf32>
    %61 = arith.addf %55, %60 : vector<8x256xf32>
    %62 = vector.extract_strided_slice %24 {offsets = [7, 0, 0], sizes = [1, 8, 1], strides = [1, 1, 1]} : vector<9x8x1xf32> to vector<1x8x1xf32>
    %63 = vector.shape_cast %62 : vector<1x8x1xf32> to vector<8x1xf32>
    %c247_i32_18 = arith.constant 247 : i32
    %64 = tpu.dynamic_rotate %20 by %c247_i32_18 dim 1 : vector<8x256xf32>, i32 -> vector<8x256xf32>
    %65 = vector.broadcast %63 : vector<8x1xf32> to vector<8x256xf32>
    %66 = arith.mulf %65, %64 : vector<8x256xf32>
    %67 = arith.addf %61, %66 : vector<8x256xf32>
    %68 = vector.extract_strided_slice %24 {offsets = [8, 0, 0], sizes = [1, 8, 1], strides = [1, 1, 1]} : vector<9x8x1xf32> to vector<1x8x1xf32>
    %69 = vector.shape_cast %68 : vector<1x8x1xf32> to vector<8x1xf32>
    %c246_i32 = arith.constant 246 : i32
    %70 = tpu.dynamic_rotate %19 by %c246_i32 dim 1 : vector<8x256xf32>, i32 -> vector<8x256xf32>
    %71 = vector.broadcast %69 : vector<8x1xf32> to vector<8x256xf32>
    %72 = arith.mulf %71, %70 : vector<8x256xf32>
    %73 = arith.addf %67, %72 : vector<8x256xf32>
    %c0_19 = arith.constant 0 : index
    %c0_20 = arith.constant 0 : index
    %c0_21 = arith.constant 0 : index
    %74 = vector.load %arg6[%c0_19, %c0_20, %c0_21] : memref<3x8x1xf32, #tpu.memory_space<vmem>>, vector<1x8x1xf32>
    %75 = vector.shape_cast %74 : vector<1x8x1xf32> to vector<8x1xf32>
    %76 = vector.broadcast %75 : vector<8x1xf32> to vector<8x256xf32>
    %77 = arith.addf %73, %76 : vector<8x256xf32>
    %78 = vector.broadcast %1 : vector<1x256xf32> to vector<8x256xf32>
    %79 = arith.mulf %77, %78 : vector<8x256xf32>
    %c0_22 = arith.constant 0 : index
    %c0_23 = arith.constant 0 : index
    %c0_24 = arith.constant 0 : index
    %c0_25 = arith.constant 0 : index
    %80 = vector.load %arg8[%c0_22, %c0_23, %c0_24, %c0_25] : memref<3x9x8x1xf32, #tpu.memory_space<vmem>>, vector<1x9x8x1xf32>
    %81 = vector.shape_cast %80 : vector<1x9x8x1xf32> to vector<9x8x1xf32>
    %82 = vector.extract_strided_slice %81 {offsets = [4, 0, 0], sizes = [1, 8, 1], strides = [1, 1, 1]} : vector<9x8x1xf32> to vector<1x8x1xf32>
    %83 = vector.shape_cast %82 : vector<1x8x1xf32> to vector<8x1xf32>
    %84 = vector.broadcast %83 : vector<8x1xf32> to vector<8x256xf32>
    %85 = arith.mulf %84, %79 : vector<8x256xf32>
    %86 = vector.extract_strided_slice %81 {offsets = [0, 0, 0], sizes = [1, 8, 1], strides = [1, 1, 1]} : vector<9x8x1xf32> to vector<1x8x1xf32>
    %87 = vector.shape_cast %86 : vector<1x8x1xf32> to vector<8x1xf32>
    %c10_i32 = arith.constant 10 : i32
    %88 = tpu.dynamic_rotate %79 by %c10_i32 dim 1 : vector<8x256xf32>, i32 -> vector<8x256xf32>
    %89 = vector.broadcast %87 : vector<8x1xf32> to vector<8x256xf32>
    %90 = arith.mulf %89, %88 : vector<8x256xf32>
    %91 = arith.addf %85, %90 : vector<8x256xf32>
    %92 = vector.extract_strided_slice %81 {offsets = [1, 0, 0], sizes = [1, 8, 1], strides = [1, 1, 1]} : vector<9x8x1xf32> to vector<1x8x1xf32>
    %93 = vector.shape_cast %92 : vector<1x8x1xf32> to vector<8x1xf32>
    %c9_i32 = arith.constant 9 : i32
    %94 = tpu.dynamic_rotate %79 by %c9_i32 dim 1 : vector<8x256xf32>, i32 -> vector<8x256xf32>
    %95 = vector.broadcast %93 : vector<8x1xf32> to vector<8x256xf32>
    %96 = arith.mulf %95, %94 : vector<8x256xf32>
    %97 = arith.addf %91, %96 : vector<8x256xf32>
    %98 = vector.extract_strided_slice %81 {offsets = [2, 0, 0], sizes = [1, 8, 1], strides = [1, 1, 1]} : vector<9x8x1xf32> to vector<1x8x1xf32>
    %99 = vector.shape_cast %98 : vector<1x8x1xf32> to vector<8x1xf32>
    %c8_i32 = arith.constant 8 : i32
    %100 = tpu.dynamic_rotate %79 by %c8_i32 dim 1 : vector<8x256xf32>, i32 -> vector<8x256xf32>
    %101 = vector.broadcast %99 : vector<8x1xf32> to vector<8x256xf32>
    %102 = arith.mulf %101, %100 : vector<8x256xf32>
    %103 = arith.addf %97, %102 : vector<8x256xf32>
    %104 = vector.extract_strided_slice %81 {offsets = [3, 0, 0], sizes = [1, 8, 1], strides = [1, 1, 1]} : vector<9x8x1xf32> to vector<1x8x1xf32>
    %105 = vector.shape_cast %104 : vector<1x8x1xf32> to vector<8x1xf32>
    %c1_i32 = arith.constant 1 : i32
    %106 = tpu.dynamic_rotate %79 by %c1_i32 dim 1 : vector<8x256xf32>, i32 -> vector<8x256xf32>
    %107 = vector.broadcast %105 : vector<8x1xf32> to vector<8x256xf32>
    %108 = arith.mulf %107, %106 : vector<8x256xf32>
    %109 = arith.addf %103, %108 : vector<8x256xf32>
    %110 = vector.extract_strided_slice %81 {offsets = [5, 0, 0], sizes = [1, 8, 1], strides = [1, 1, 1]} : vector<9x8x1xf32> to vector<1x8x1xf32>
    %111 = vector.shape_cast %110 : vector<1x8x1xf32> to vector<8x1xf32>
    %c255_i32_26 = arith.constant 255 : i32
    %112 = tpu.dynamic_rotate %79 by %c255_i32_26 dim 1 : vector<8x256xf32>, i32 -> vector<8x256xf32>
    %113 = vector.broadcast %111 : vector<8x1xf32> to vector<8x256xf32>
    %114 = arith.mulf %113, %112 : vector<8x256xf32>
    %115 = arith.addf %109, %114 : vector<8x256xf32>
    %116 = vector.extract_strided_slice %81 {offsets = [6, 0, 0], sizes = [1, 8, 1], strides = [1, 1, 1]} : vector<9x8x1xf32> to vector<1x8x1xf32>
    %117 = vector.shape_cast %116 : vector<1x8x1xf32> to vector<8x1xf32>
    %c248_i32 = arith.constant 248 : i32
    %118 = tpu.dynamic_rotate %79 by %c248_i32 dim 1 : vector<8x256xf32>, i32 -> vector<8x256xf32>
    %119 = vector.broadcast %117 : vector<8x1xf32> to vector<8x256xf32>
    %120 = arith.mulf %119, %118 : vector<8x256xf32>
    %121 = arith.addf %115, %120 : vector<8x256xf32>
    %122 = vector.extract_strided_slice %81 {offsets = [7, 0, 0], sizes = [1, 8, 1], strides = [1, 1, 1]} : vector<9x8x1xf32> to vector<1x8x1xf32>
    %123 = vector.shape_cast %122 : vector<1x8x1xf32> to vector<8x1xf32>
    %c247_i32_27 = arith.constant 247 : i32
    %124 = tpu.dynamic_rotate %79 by %c247_i32_27 dim 1 : vector<8x256xf32>, i32 -> vector<8x256xf32>
    %125 = vector.broadcast %123 : vector<8x1xf32> to vector<8x256xf32>
    %126 = arith.mulf %125, %124 : vector<8x256xf32>
    %127 = arith.addf %121, %126 : vector<8x256xf32>
    %128 = vector.extract_strided_slice %81 {offsets = [8, 0, 0], sizes = [1, 8, 1], strides = [1, 1, 1]} : vector<9x8x1xf32> to vector<1x8x1xf32>
    %129 = vector.shape_cast %128 : vector<1x8x1xf32> to vector<8x1xf32>
    %c246_i32_28 = arith.constant 246 : i32
    %130 = tpu.dynamic_rotate %79 by %c246_i32_28 dim 1 : vector<8x256xf32>, i32 -> vector<8x256xf32>
    %131 = vector.broadcast %129 : vector<8x1xf32> to vector<8x256xf32>
    %132 = arith.mulf %131, %130 : vector<8x256xf32>
    %133 = arith.addf %127, %132 : vector<8x256xf32>
    %c0_29 = arith.constant 0 : index
    %c0_30 = arith.constant 0 : index
    %c0_31 = arith.constant 0 : index
    %134 = vector.load %arg9[%c0_29, %c0_30, %c0_31] : memref<3x8x1xf32, #tpu.memory_space<vmem>>, vector<1x8x1xf32>
    %135 = vector.shape_cast %134 : vector<1x8x1xf32> to vector<8x1xf32>
    %136 = vector.broadcast %135 : vector<8x1xf32> to vector<8x256xf32>
    %137 = arith.addf %133, %136 : vector<8x256xf32>
    %138 = vector.broadcast %1 : vector<1x256xf32> to vector<8x256xf32>
    %139 = arith.mulf %137, %138 : vector<8x256xf32>
    %cst_32 = arith.constant 3.000000e+00 : f32
    %140 = vector.broadcast %cst_32 : f32 to vector<8x256xf32>
    %141 = arith.addf %139, %140 : vector<8x256xf32>
    %cst_33 = arith.constant 0.000000e+00 : f32
    %cst_34 = arith.constant 6.000000e+00 : f32
    %142 = vector.broadcast %cst_33 : f32 to vector<8x256xf32>
    %143 = arith.maximumf %142, %141 : vector<8x256xf32>
    %144 = vector.broadcast %cst_34 : f32 to vector<8x256xf32>
    %145 = arith.minimumf %144, %143 : vector<8x256xf32>
    %146 = arith.mulf %139, %145 : vector<8x256xf32>
    %c0_35 = arith.constant 0 : index
    %c0_36 = arith.constant 0 : index
    %147 = vector.load %arg13[%c0_35, %c0_36] : memref<24x256xf32, #tpu.memory_space<vmem>>, vector<8x256xf32>
    tpu.vector_store %arg13[%c0_35, %c0_36], %146 {strides = array<i32>} : memref<24x256xf32, #tpu.memory_space<vmem>>, vector<8x256xf32>,
    %148 = vector.extract_strided_slice %17 {offsets = [8, 0], sizes = [8, 1024], strides = [1, 1]} : vector<24x1024xf32> to vector<8x1024xf32>
    %149 = vector.extract_strided_slice %148 {offsets = [0, 0], sizes = [8, 256], strides = [1, 1]} : vector<8x1024xf32> to vector<8x256xf32>
    %150 = vector.extract_strided_slice %148 {offsets = [0, 256], sizes = [8, 256], strides = [1, 1]} : vector<8x1024xf32> to vector<8x256xf32>
    %151 = vector.extract_strided_slice %148 {offsets = [0, 512], sizes = [8, 256], strides = [1, 1]} : vector<8x1024xf32> to vector<8x256xf32>
    %152 = vector.extract_strided_slice %148 {offsets = [0, 768], sizes = [8, 256], strides = [1, 1]} : vector<8x1024xf32> to vector<8x256xf32>
    %c1 = arith.constant 1 : index
    %c0_37 = arith.constant 0 : index
    %c0_38 = arith.constant 0 : index
    %c0_39 = arith.constant 0 : index
    %153 = vector.load %arg5[%c1, %c0_37, %c0_38, %c0_39] : memref<3x9x8x1xf32, #tpu.memory_space<vmem>>, vector<1x9x8x1xf32>
    %154 = vector.shape_cast %153 : vector<1x9x8x1xf32> to vector<9x8x1xf32>
    %155 = vector.extract_strided_slice %154 {offsets = [0, 0, 0], sizes = [1, 8, 1], strides = [1, 1, 1]} : vector<9x8x1xf32> to vector<1x8x1xf32>
    %156 = vector.shape_cast %155 : vector<1x8x1xf32> to vector<8x1xf32>
    %157 = vector.broadcast %156 : vector<8x1xf32> to vector<8x256xf32>
    %158 = arith.mulf %157, %149 : vector<8x256xf32>
    %159 = vector.extract_strided_slice %154 {offsets = [1, 0, 0], sizes = [1, 8, 1], strides = [1, 1, 1]} : vector<9x8x1xf32> to vector<1x8x1xf32>
    %160 = vector.shape_cast %159 : vector<1x8x1xf32> to vector<8x1xf32>
    %161 = vector.broadcast %160 : vector<8x1xf32> to vector<8x256xf32>
    %162 = arith.mulf %161, %150 : vector<8x256xf32>
    %163 = arith.addf %158, %162 : vector<8x256xf32>
    %164 = vector.extract_strided_slice %154 {offsets = [2, 0, 0], sizes = [1, 8, 1], strides = [1, 1, 1]} : vector<9x8x1xf32> to vector<1x8x1xf32>
    %165 = vector.shape_cast %164 : vector<1x8x1xf32> to vector<8x1xf32>
    %c255_i32_40 = arith.constant 255 : i32
    %166 = tpu.dynamic_rotate %149 by %c255_i32_40 dim 1 : vector<8x256xf32>, i32 -> vector<8x256xf32>
    %167 = vector.broadcast %165 : vector<8x1xf32> to vector<8x256xf32>
    %168 = arith.mulf %167, %166 : vector<8x256xf32>
    %169 = arith.addf %163, %168 : vector<8x256xf32>
    %170 = vector.extract_strided_slice %154 {offsets = [3, 0, 0], sizes = [1, 8, 1], strides = [1, 1, 1]} : vector<9x8x1xf32> to vector<1x8x1xf32>
    %171 = vector.shape_cast %170 : vector<1x8x1xf32> to vector<8x1xf32>
    %172 = vector.broadcast %171 : vector<8x1xf32> to vector<8x256xf32>
    %173 = arith.mulf %172, %151 : vector<8x256xf32>
    %174 = arith.addf %169, %173 : vector<8x256xf32>
    %175 = vector.extract_strided_slice %154 {offsets = [4, 0, 0], sizes = [1, 8, 1], strides = [1, 1, 1]} : vector<9x8x1xf32> to vector<1x8x1xf32>
    %176 = vector.shape_cast %175 : vector<1x8x1xf32> to vector<8x1xf32>
    %177 = vector.broadcast %176 : vector<8x1xf32> to vector<8x256xf32>
    %178 = arith.mulf %177, %152 : vector<8x256xf32>
    %179 = arith.addf %174, %178 : vector<8x256xf32>
    %180 = vector.extract_strided_slice %154 {offsets = [5, 0, 0], sizes = [1, 8, 1], strides = [1, 1, 1]} : vector<9x8x1xf32> to vector<1x8x1xf32>
    %181 = vector.shape_cast %180 : vector<1x8x1xf32> to vector<8x1xf32>
    %c255_i32_41 = arith.constant 255 : i32
    %182 = tpu.dynamic_rotate %151 by %c255_i32_41 dim 1 : vector<8x256xf32>, i32 -> vector<8x256xf32>
    %183 = vector.broadcast %181 : vector<8x1xf32> to vector<8x256xf32>
    %184 = arith.mulf %183, %182 : vector<8x256xf32>
    %185 = arith.addf %179, %184 : vector<8x256xf32>
    %186 = vector.extract_strided_slice %154 {offsets = [6, 0, 0], sizes = [1, 8, 1], strides = [1, 1, 1]} : vector<9x8x1xf32> to vector<1x8x1xf32>
    %187 = vector.shape_cast %186 : vector<1x8x1xf32> to vector<8x1xf32>
    %c247_i32_42 = arith.constant 247 : i32
    %188 = tpu.dynamic_rotate %149 by %c247_i32_42 dim 1 : vector<8x256xf32>, i32 -> vector<8x256xf32>
    %189 = vector.broadcast %187 : vector<8x1xf32> to vector<8x256xf32>
    %190 = arith.mulf %189, %188 : vector<8x256xf32>
    %191 = arith.addf %185, %190 : vector<8x256xf32>
    %192 = vector.extract_strided_slice %154 {offsets = [7, 0, 0], sizes = [1, 8, 1], strides = [1, 1, 1]} : vector<9x8x1xf32> to vector<1x8x1xf32>
    %193 = vector.shape_cast %192 : vector<1x8x1xf32> to vector<8x1xf32>
    %c247_i32_43 = arith.constant 247 : i32
    %194 = tpu.dynamic_rotate %150 by %c247_i32_43 dim 1 : vector<8x256xf32>, i32 -> vector<8x256xf32>
    %195 = vector.broadcast %193 : vector<8x1xf32> to vector<8x256xf32>
    %196 = arith.mulf %195, %194 : vector<8x256xf32>
    %197 = arith.addf %191, %196 : vector<8x256xf32>
    %198 = vector.extract_strided_slice %154 {offsets = [8, 0, 0], sizes = [1, 8, 1], strides = [1, 1, 1]} : vector<9x8x1xf32> to vector<1x8x1xf32>
    %199 = vector.shape_cast %198 : vector<1x8x1xf32> to vector<8x1xf32>
    %c246_i32_44 = arith.constant 246 : i32
    %200 = tpu.dynamic_rotate %149 by %c246_i32_44 dim 1 : vector<8x256xf32>, i32 -> vector<8x256xf32>
    %201 = vector.broadcast %199 : vector<8x1xf32> to vector<8x256xf32>
    %202 = arith.mulf %201, %200 : vector<8x256xf32>
    %203 = arith.addf %197, %202 : vector<8x256xf32>
    %c1_45 = arith.constant 1 : index
    %c0_46 = arith.constant 0 : index
    %c0_47 = arith.constant 0 : index
    %204 = vector.load %arg6[%c1_45, %c0_46, %c0_47] : memref<3x8x1xf32, #tpu.memory_space<vmem>>, vector<1x8x1xf32>
    %205 = vector.shape_cast %204 : vector<1x8x1xf32> to vector<8x1xf32>
    %206 = vector.broadcast %205 : vector<8x1xf32> to vector<8x256xf32>
    %207 = arith.addf %203, %206 : vector<8x256xf32>
    %208 = vector.broadcast %1 : vector<1x256xf32> to vector<8x256xf32>
    %209 = arith.mulf %207, %208 : vector<8x256xf32>
    %210 = arith.addf %209, %139 : vector<8x256xf32>
    %c1_48 = arith.constant 1 : index
    %c0_49 = arith.constant 0 : index
    %c0_50 = arith.constant 0 : index
    %c0_51 = arith.constant 0 : index
    %211 = vector.load %arg8[%c1_48, %c0_49, %c0_50, %c0_51] : memref<3x9x8x1xf32, #tpu.memory_space<vmem>>, vector<1x9x8x1xf32>
    %212 = vector.shape_cast %211 : vector<1x9x8x1xf32> to vector<9x8x1xf32>
    %213 = vector.extract_strided_slice %212 {offsets = [4, 0, 0], sizes = [1, 8, 1], strides = [1, 1, 1]} : vector<9x8x1xf32> to vector<1x8x1xf32>
    %214 = vector.shape_cast %213 : vector<1x8x1xf32> to vector<8x1xf32>
    %215 = vector.broadcast %214 : vector<8x1xf32> to vector<8x256xf32>
    %216 = arith.mulf %215, %210 : vector<8x256xf32>
    %217 = vector.extract_strided_slice %212 {offsets = [0, 0, 0], sizes = [1, 8, 1], strides = [1, 1, 1]} : vector<9x8x1xf32> to vector<1x8x1xf32>
    %218 = vector.shape_cast %217 : vector<1x8x1xf32> to vector<8x1xf32>
    %c10_i32_52 = arith.constant 10 : i32
    %219 = tpu.dynamic_rotate %210 by %c10_i32_52 dim 1 : vector<8x256xf32>, i32 -> vector<8x256xf32>
    %220 = vector.broadcast %218 : vector<8x1xf32> to vector<8x256xf32>
    %221 = arith.mulf %220, %219 : vector<8x256xf32>
    %222 = arith.addf %216, %221 : vector<8x256xf32>
    %223 = vector.extract_strided_slice %212 {offsets = [1, 0, 0], sizes = [1, 8, 1], strides = [1, 1, 1]} : vector<9x8x1xf32> to vector<1x8x1xf32>
    %224 = vector.shape_cast %223 : vector<1x8x1xf32> to vector<8x1xf32>
    %c9_i32_53 = arith.constant 9 : i32
    %225 = tpu.dynamic_rotate %210 by %c9_i32_53 dim 1 : vector<8x256xf32>, i32 -> vector<8x256xf32>
    %226 = vector.broadcast %224 : vector<8x1xf32> to vector<8x256xf32>
    %227 = arith.mulf %226, %225 : vector<8x256xf32>
    %228 = arith.addf %222, %227 : vector<8x256xf32>
    %229 = vector.extract_strided_slice %212 {offsets = [2, 0, 0], sizes = [1, 8, 1], strides = [1, 1, 1]} : vector<9x8x1xf32> to vector<1x8x1xf32>
    %230 = vector.shape_cast %229 : vector<1x8x1xf32> to vector<8x1xf32>
    %c8_i32_54 = arith.constant 8 : i32
    %231 = tpu.dynamic_rotate %210 by %c8_i32_54 dim 1 : vector<8x256xf32>, i32 -> vector<8x256xf32>
    %232 = vector.broadcast %230 : vector<8x1xf32> to vector<8x256xf32>
    %233 = arith.mulf %232, %231 : vector<8x256xf32>
    %234 = arith.addf %228, %233 : vector<8x256xf32>
    %235 = vector.extract_strided_slice %212 {offsets = [3, 0, 0], sizes = [1, 8, 1], strides = [1, 1, 1]} : vector<9x8x1xf32> to vector<1x8x1xf32>
    %236 = vector.shape_cast %235 : vector<1x8x1xf32> to vector<8x1xf32>
    %c1_i32_55 = arith.constant 1 : i32
    %237 = tpu.dynamic_rotate %210 by %c1_i32_55 dim 1 : vector<8x256xf32>, i32 -> vector<8x256xf32>
    %238 = vector.broadcast %236 : vector<8x1xf32> to vector<8x256xf32>
    %239 = arith.mulf %238, %237 : vector<8x256xf32>
    %240 = arith.addf %234, %239 : vector<8x256xf32>
    %241 = vector.extract_strided_slice %212 {offsets = [5, 0, 0], sizes = [1, 8, 1], strides = [1, 1, 1]} : vector<9x8x1xf32> to vector<1x8x1xf32>
    %242 = vector.shape_cast %241 : vector<1x8x1xf32> to vector<8x1xf32>
    %c255_i32_56 = arith.constant 255 : i32
    %243 = tpu.dynamic_rotate %210 by %c255_i32_56 dim 1 : vector<8x256xf32>, i32 -> vector<8x256xf32>
    %244 = vector.broadcast %242 : vector<8x1xf32> to vector<8x256xf32>
    %245 = arith.mulf %244, %243 : vector<8x256xf32>
    %246 = arith.addf %240, %245 : vector<8x256xf32>
    %247 = vector.extract_strided_slice %212 {offsets = [6, 0, 0], sizes = [1, 8, 1], strides = [1, 1, 1]} : vector<9x8x1xf32> to vector<1x8x1xf32>
    %248 = vector.shape_cast %247 : vector<1x8x1xf32> to vector<8x1xf32>
    %c248_i32_57 = arith.constant 248 : i32
    %249 = tpu.dynamic_rotate %210 by %c248_i32_57 dim 1 : vector<8x256xf32>, i32 -> vector<8x256xf32>
    %250 = vector.broadcast %248 : vector<8x1xf32> to vector<8x256xf32>
    %251 = arith.mulf %250, %249 : vector<8x256xf32>
    %252 = arith.addf %246, %251 : vector<8x256xf32>
    %253 = vector.extract_strided_slice %212 {offsets = [7, 0, 0], sizes = [1, 8, 1], strides = [1, 1, 1]} : vector<9x8x1xf32> to vector<1x8x1xf32>
    %254 = vector.shape_cast %253 : vector<1x8x1xf32> to vector<8x1xf32>
    %c247_i32_58 = arith.constant 247 : i32
    %255 = tpu.dynamic_rotate %210 by %c247_i32_58 dim 1 : vector<8x256xf32>, i32 -> vector<8x256xf32>
    %256 = vector.broadcast %254 : vector<8x1xf32> to vector<8x256xf32>
    %257 = arith.mulf %256, %255 : vector<8x256xf32>
    %258 = arith.addf %252, %257 : vector<8x256xf32>
    %259 = vector.extract_strided_slice %212 {offsets = [8, 0, 0], sizes = [1, 8, 1], strides = [1, 1, 1]} : vector<9x8x1xf32> to vector<1x8x1xf32>
    %260 = vector.shape_cast %259 : vector<1x8x1xf32> to vector<8x1xf32>
    %c246_i32_59 = arith.constant 246 : i32
    %261 = tpu.dynamic_rotate %210 by %c246_i32_59 dim 1 : vector<8x256xf32>, i32 -> vector<8x256xf32>
    %262 = vector.broadcast %260 : vector<8x1xf32> to vector<8x256xf32>
    %263 = arith.mulf %262, %261 : vector<8x256xf32>
    %264 = arith.addf %258, %263 : vector<8x256xf32>
    %c1_60 = arith.constant 1 : index
    %c0_61 = arith.constant 0 : index
    %c0_62 = arith.constant 0 : index
    %265 = vector.load %arg9[%c1_60, %c0_61, %c0_62] : memref<3x8x1xf32, #tpu.memory_space<vmem>>, vector<1x8x1xf32>
    %266 = vector.shape_cast %265 : vector<1x8x1xf32> to vector<8x1xf32>
    %267 = vector.broadcast %266 : vector<8x1xf32> to vector<8x256xf32>
    %268 = arith.addf %264, %267 : vector<8x256xf32>
    %269 = vector.broadcast %1 : vector<1x256xf32> to vector<8x256xf32>
    %270 = arith.mulf %268, %269 : vector<8x256xf32>
    %cst_63 = arith.constant 3.000000e+00 : f32
    %271 = vector.broadcast %cst_63 : f32 to vector<8x256xf32>
    %272 = arith.addf %270, %271 : vector<8x256xf32>
    %cst_64 = arith.constant 0.000000e+00 : f32
    %cst_65 = arith.constant 6.000000e+00 : f32
    %273 = vector.broadcast %cst_64 : f32 to vector<8x256xf32>
    %274 = arith.maximumf %273, %272 : vector<8x256xf32>
    %275 = vector.broadcast %cst_65 : f32 to vector<8x256xf32>
    %276 = arith.minimumf %275, %274 : vector<8x256xf32>
    %277 = arith.mulf %270, %276 : vector<8x256xf32>
    %c8 = arith.constant 8 : index
    %c0_66 = arith.constant 0 : index
    %278 = vector.load %arg13[%c8, %c0_66] : memref<24x256xf32, #tpu.memory_space<vmem>>, vector<8x256xf32>
    tpu.vector_store %arg13[%c8, %c0_66], %277 {strides = array<i32>} : memref<24x256xf32, #tpu.memory_space<vmem>>, vector<8x256xf32>,
    %279 = vector.extract_strided_slice %17 {offsets = [16, 0], sizes = [8, 1024], strides = [1, 1]} : vector<24x1024xf32> to vector<8x1024xf32>
    %280 = vector.extract_strided_slice %279 {offsets = [0, 0], sizes = [8, 256], strides = [1, 1]} : vector<8x1024xf32> to vector<8x256xf32>
    %281 = vector.extract_strided_slice %279 {offsets = [0, 256], sizes = [8, 256], strides = [1, 1]} : vector<8x1024xf32> to vector<8x256xf32>
    %282 = vector.extract_strided_slice %279 {offsets = [0, 512], sizes = [8, 256], strides = [1, 1]} : vector<8x1024xf32> to vector<8x256xf32>
    %283 = vector.extract_strided_slice %279 {offsets = [0, 768], sizes = [8, 256], strides = [1, 1]} : vector<8x1024xf32> to vector<8x256xf32>
    %c2 = arith.constant 2 : index
    %c0_67 = arith.constant 0 : index
    %c0_68 = arith.constant 0 : index
    %c0_69 = arith.constant 0 : index
    %284 = vector.load %arg5[%c2, %c0_67, %c0_68, %c0_69] : memref<3x9x8x1xf32, #tpu.memory_space<vmem>>, vector<1x9x8x1xf32>
    %285 = vector.shape_cast %284 : vector<1x9x8x1xf32> to vector<9x8x1xf32>
    %286 = vector.extract_strided_slice %285 {offsets = [0, 0, 0], sizes = [1, 8, 1], strides = [1, 1, 1]} : vector<9x8x1xf32> to vector<1x8x1xf32>
    %287 = vector.shape_cast %286 : vector<1x8x1xf32> to vector<8x1xf32>
    %288 = vector.broadcast %287 : vector<8x1xf32> to vector<8x256xf32>
    %289 = arith.mulf %288, %280 : vector<8x256xf32>
    %290 = vector.extract_strided_slice %285 {offsets = [1, 0, 0], sizes = [1, 8, 1], strides = [1, 1, 1]} : vector<9x8x1xf32> to vector<1x8x1xf32>
    %291 = vector.shape_cast %290 : vector<1x8x1xf32> to vector<8x1xf32>
    %292 = vector.broadcast %291 : vector<8x1xf32> to vector<8x256xf32>
    %293 = arith.mulf %292, %281 : vector<8x256xf32>
    %294 = arith.addf %289, %293 : vector<8x256xf32>
    %295 = vector.extract_strided_slice %285 {offsets = [2, 0, 0], sizes = [1, 8, 1], strides = [1, 1, 1]} : vector<9x8x1xf32> to vector<1x8x1xf32>
    %296 = vector.shape_cast %295 : vector<1x8x1xf32> to vector<8x1xf32>
    %c255_i32_70 = arith.constant 255 : i32
    %297 = tpu.dynamic_rotate %280 by %c255_i32_70 dim 1 : vector<8x256xf32>, i32 -> vector<8x256xf32>
    %298 = vector.broadcast %296 : vector<8x1xf32> to vector<8x256xf32>
    %299 = arith.mulf %298, %297 : vector<8x256xf32>
    %300 = arith.addf %294, %299 : vector<8x256xf32>
    %301 = vector.extract_strided_slice %285 {offsets = [3, 0, 0], sizes = [1, 8, 1], strides = [1, 1, 1]} : vector<9x8x1xf32> to vector<1x8x1xf32>
    %302 = vector.shape_cast %301 : vector<1x8x1xf32> to vector<8x1xf32>
    %303 = vector.broadcast %302 : vector<8x1xf32> to vector<8x256xf32>
    %304 = arith.mulf %303, %282 : vector<8x256xf32>
    %305 = arith.addf %300, %304 : vector<8x256xf32>
    %306 = vector.extract_strided_slice %285 {offsets = [4, 0, 0], sizes = [1, 8, 1], strides = [1, 1, 1]} : vector<9x8x1xf32> to vector<1x8x1xf32>
    %307 = vector.shape_cast %306 : vector<1x8x1xf32> to vector<8x1xf32>
    %308 = vector.broadcast %307 : vector<8x1xf32> to vector<8x256xf32>
    %309 = arith.mulf %308, %283 : vector<8x256xf32>
    %310 = arith.addf %305, %309 : vector<8x256xf32>
    %311 = vector.extract_strided_slice %285 {offsets = [5, 0, 0], sizes = [1, 8, 1], strides = [1, 1, 1]} : vector<9x8x1xf32> to vector<1x8x1xf32>
    %312 = vector.shape_cast %311 : vector<1x8x1xf32> to vector<8x1xf32>
    %c255_i32_71 = arith.constant 255 : i32
    %313 = tpu.dynamic_rotate %282 by %c255_i32_71 dim 1 : vector<8x256xf32>, i32 -> vector<8x256xf32>
    %314 = vector.broadcast %312 : vector<8x1xf32> to vector<8x256xf32>
    %315 = arith.mulf %314, %313 : vector<8x256xf32>
    %316 = arith.addf %310, %315 : vector<8x256xf32>
    %317 = vector.extract_strided_slice %285 {offsets = [6, 0, 0], sizes = [1, 8, 1], strides = [1, 1, 1]} : vector<9x8x1xf32> to vector<1x8x1xf32>
    %318 = vector.shape_cast %317 : vector<1x8x1xf32> to vector<8x1xf32>
    %c247_i32_72 = arith.constant 247 : i32
    %319 = tpu.dynamic_rotate %280 by %c247_i32_72 dim 1 : vector<8x256xf32>, i32 -> vector<8x256xf32>
    %320 = vector.broadcast %318 : vector<8x1xf32> to vector<8x256xf32>
    %321 = arith.mulf %320, %319 : vector<8x256xf32>
    %322 = arith.addf %316, %321 : vector<8x256xf32>
    %323 = vector.extract_strided_slice %285 {offsets = [7, 0, 0], sizes = [1, 8, 1], strides = [1, 1, 1]} : vector<9x8x1xf32> to vector<1x8x1xf32>
    %324 = vector.shape_cast %323 : vector<1x8x1xf32> to vector<8x1xf32>
    %c247_i32_73 = arith.constant 247 : i32
    %325 = tpu.dynamic_rotate %281 by %c247_i32_73 dim 1 : vector<8x256xf32>, i32 -> vector<8x256xf32>
    %326 = vector.broadcast %324 : vector<8x1xf32> to vector<8x256xf32>
    %327 = arith.mulf %326, %325 : vector<8x256xf32>
    %328 = arith.addf %322, %327 : vector<8x256xf32>
    %329 = vector.extract_strided_slice %285 {offsets = [8, 0, 0], sizes = [1, 8, 1], strides = [1, 1, 1]} : vector<9x8x1xf32> to vector<1x8x1xf32>
    %330 = vector.shape_cast %329 : vector<1x8x1xf32> to vector<8x1xf32>
    %c246_i32_74 = arith.constant 246 : i32
    %331 = tpu.dynamic_rotate %280 by %c246_i32_74 dim 1 : vector<8x256xf32>, i32 -> vector<8x256xf32>
    %332 = vector.broadcast %330 : vector<8x1xf32> to vector<8x256xf32>
    %333 = arith.mulf %332, %331 : vector<8x256xf32>
    %334 = arith.addf %328, %333 : vector<8x256xf32>
    %c2_75 = arith.constant 2 : index
    %c0_76 = arith.constant 0 : index
    %c0_77 = arith.constant 0 : index
    %335 = vector.load %arg6[%c2_75, %c0_76, %c0_77] : memref<3x8x1xf32, #tpu.memory_space<vmem>>, vector<1x8x1xf32>
    %336 = vector.shape_cast %335 : vector<1x8x1xf32> to vector<8x1xf32>
    %337 = vector.broadcast %336 : vector<8x1xf32> to vector<8x256xf32>
    %338 = arith.addf %334, %337 : vector<8x256xf32>
    %339 = vector.broadcast %1 : vector<1x256xf32> to vector<8x256xf32>
    %340 = arith.mulf %338, %339 : vector<8x256xf32>
    %341 = arith.addf %340, %270 : vector<8x256xf32>
    %c2_78 = arith.constant 2 : index
    %c0_79 = arith.constant 0 : index
    %c0_80 = arith.constant 0 : index
    %c0_81 = arith.constant 0 : index
    %342 = vector.load %arg8[%c2_78, %c0_79, %c0_80, %c0_81] : memref<3x9x8x1xf32, #tpu.memory_space<vmem>>, vector<1x9x8x1xf32>
    %343 = vector.shape_cast %342 : vector<1x9x8x1xf32> to vector<9x8x1xf32>
    %344 = vector.extract_strided_slice %343 {offsets = [4, 0, 0], sizes = [1, 8, 1], strides = [1, 1, 1]} : vector<9x8x1xf32> to vector<1x8x1xf32>
    %345 = vector.shape_cast %344 : vector<1x8x1xf32> to vector<8x1xf32>
    %346 = vector.broadcast %345 : vector<8x1xf32> to vector<8x256xf32>
    %347 = arith.mulf %346, %341 : vector<8x256xf32>
    %348 = vector.extract_strided_slice %343 {offsets = [0, 0, 0], sizes = [1, 8, 1], strides = [1, 1, 1]} : vector<9x8x1xf32> to vector<1x8x1xf32>
    %349 = vector.shape_cast %348 : vector<1x8x1xf32> to vector<8x1xf32>
    %c10_i32_82 = arith.constant 10 : i32
    %350 = tpu.dynamic_rotate %341 by %c10_i32_82 dim 1 : vector<8x256xf32>, i32 -> vector<8x256xf32>
    %351 = vector.broadcast %349 : vector<8x1xf32> to vector<8x256xf32>
    %352 = arith.mulf %351, %350 : vector<8x256xf32>
    %353 = arith.addf %347, %352 : vector<8x256xf32>
    %354 = vector.extract_strided_slice %343 {offsets = [1, 0, 0], sizes = [1, 8, 1], strides = [1, 1, 1]} : vector<9x8x1xf32> to vector<1x8x1xf32>
    %355 = vector.shape_cast %354 : vector<1x8x1xf32> to vector<8x1xf32>
    %c9_i32_83 = arith.constant 9 : i32
    %356 = tpu.dynamic_rotate %341 by %c9_i32_83 dim 1 : vector<8x256xf32>, i32 -> vector<8x256xf32>
    %357 = vector.broadcast %355 : vector<8x1xf32> to vector<8x256xf32>
    %358 = arith.mulf %357, %356 : vector<8x256xf32>
    %359 = arith.addf %353, %358 : vector<8x256xf32>
    %360 = vector.extract_strided_slice %343 {offsets = [2, 0, 0], sizes = [1, 8, 1], strides = [1, 1, 1]} : vector<9x8x1xf32> to vector<1x8x1xf32>
    %361 = vector.shape_cast %360 : vector<1x8x1xf32> to vector<8x1xf32>
    %c8_i32_84 = arith.constant 8 : i32
    %362 = tpu.dynamic_rotate %341 by %c8_i32_84 dim 1 : vector<8x256xf32>, i32 -> vector<8x256xf32>
    %363 = vector.broadcast %361 : vector<8x1xf32> to vector<8x256xf32>
    %364 = arith.mulf %363, %362 : vector<8x256xf32>
    %365 = arith.addf %359, %364 : vector<8x256xf32>
    %366 = vector.extract_strided_slice %343 {offsets = [3, 0, 0], sizes = [1, 8, 1], strides = [1, 1, 1]} : vector<9x8x1xf32> to vector<1x8x1xf32>
    %367 = vector.shape_cast %366 : vector<1x8x1xf32> to vector<8x1xf32>
    %c1_i32_85 = arith.constant 1 : i32
    %368 = tpu.dynamic_rotate %341 by %c1_i32_85 dim 1 : vector<8x256xf32>, i32 -> vector<8x256xf32>
    %369 = vector.broadcast %367 : vector<8x1xf32> to vector<8x256xf32>
    %370 = arith.mulf %369, %368 : vector<8x256xf32>
    %371 = arith.addf %365, %370 : vector<8x256xf32>
    %372 = vector.extract_strided_slice %343 {offsets = [5, 0, 0], sizes = [1, 8, 1], strides = [1, 1, 1]} : vector<9x8x1xf32> to vector<1x8x1xf32>
    %373 = vector.shape_cast %372 : vector<1x8x1xf32> to vector<8x1xf32>
    %c255_i32_86 = arith.constant 255 : i32
    %374 = tpu.dynamic_rotate %341 by %c255_i32_86 dim 1 : vector<8x256xf32>, i32 -> vector<8x256xf32>
    %375 = vector.broadcast %373 : vector<8x1xf32> to vector<8x256xf32>
    %376 = arith.mulf %375, %374 : vector<8x256xf32>
    %377 = arith.addf %371, %376 : vector<8x256xf32>
    %378 = vector.extract_strided_slice %343 {offsets = [6, 0, 0], sizes = [1, 8, 1], strides = [1, 1, 1]} : vector<9x8x1xf32> to vector<1x8x1xf32>
    %379 = vector.shape_cast %378 : vector<1x8x1xf32> to vector<8x1xf32>
    %c248_i32_87 = arith.constant 248 : i32
    %380 = tpu.dynamic_rotate %341 by %c248_i32_87 dim 1 : vector<8x256xf32>, i32 -> vector<8x256xf32>
    %381 = vector.broadcast %379 : vector<8x1xf32> to vector<8x256xf32>
    %382 = arith.mulf %381, %380 : vector<8x256xf32>
    %383 = arith.addf %377, %382 : vector<8x256xf32>
    %384 = vector.extract_strided_slice %343 {offsets = [7, 0, 0], sizes = [1, 8, 1], strides = [1, 1, 1]} : vector<9x8x1xf32> to vector<1x8x1xf32>
    %385 = vector.shape_cast %384 : vector<1x8x1xf32> to vector<8x1xf32>
    %c247_i32_88 = arith.constant 247 : i32
    %386 = tpu.dynamic_rotate %341 by %c247_i32_88 dim 1 : vector<8x256xf32>, i32 -> vector<8x256xf32>
    %387 = vector.broadcast %385 : vector<8x1xf32> to vector<8x256xf32>
    %388 = arith.mulf %387, %386 : vector<8x256xf32>
    %389 = arith.addf %383, %388 : vector<8x256xf32>
    %390 = vector.extract_strided_slice %343 {offsets = [8, 0, 0], sizes = [1, 8, 1], strides = [1, 1, 1]} : vector<9x8x1xf32> to vector<1x8x1xf32>
    %391 = vector.shape_cast %390 : vector<1x8x1xf32> to vector<8x1xf32>
    %c246_i32_89 = arith.constant 246 : i32
    %392 = tpu.dynamic_rotate %341 by %c246_i32_89 dim 1 : vector<8x256xf32>, i32 -> vector<8x256xf32>
    %393 = vector.broadcast %391 : vector<8x1xf32> to vector<8x256xf32>
    %394 = arith.mulf %393, %392 : vector<8x256xf32>
    %395 = arith.addf %389, %394 : vector<8x256xf32>
    %c2_90 = arith.constant 2 : index
    %c0_91 = arith.constant 0 : index
    %c0_92 = arith.constant 0 : index
    %396 = vector.load %arg9[%c2_90, %c0_91, %c0_92] : memref<3x8x1xf32, #tpu.memory_space<vmem>>, vector<1x8x1xf32>
    %397 = vector.shape_cast %396 : vector<1x8x1xf32> to vector<8x1xf32>
    %398 = vector.broadcast %397 : vector<8x1xf32> to vector<8x256xf32>
    %399 = arith.addf %395, %398 : vector<8x256xf32>
    %400 = vector.broadcast %1 : vector<1x256xf32> to vector<8x256xf32>
    %401 = arith.mulf %399, %400 : vector<8x256xf32>
    %cst_93 = arith.constant 3.000000e+00 : f32
    %402 = vector.broadcast %cst_93 : f32 to vector<8x256xf32>
    %403 = arith.addf %401, %402 : vector<8x256xf32>
    %cst_94 = arith.constant 0.000000e+00 : f32
    %cst_95 = arith.constant 6.000000e+00 : f32
    %404 = vector.broadcast %cst_94 : f32 to vector<8x256xf32>
    %405 = arith.maximumf %404, %403 : vector<8x256xf32>
    %406 = vector.broadcast %cst_95 : f32 to vector<8x256xf32>
    %407 = arith.minimumf %406, %405 : vector<8x256xf32>
    %408 = arith.mulf %401, %407 : vector<8x256xf32>
    %c16 = arith.constant 16 : index
    %c0_96 = arith.constant 0 : index
    %409 = vector.load %arg13[%c16, %c0_96] : memref<24x256xf32, #tpu.memory_space<vmem>>, vector<8x256xf32>
    tpu.vector_store %arg13[%c16, %c0_96], %408 {strides = array<i32>} : memref<24x256xf32, #tpu.memory_space<vmem>>, vector<8x256xf32>,
    %c0_97 = arith.constant 0 : index
    %c0_98 = arith.constant 0 : index
    %410 = vector.load %arg10[%c0_97, %c0_98] : memref<8x24xf32, #tpu.memory_space<vmem>>, vector<8x24xf32>
    %c0_99 = arith.constant 0 : index
    %c0_100 = arith.constant 0 : index
    %411 = vector.load %arg13[%c0_99, %c0_100] : memref<24x256xf32, #tpu.memory_space<vmem>>, vector<24x256xf32>
    %cst_101 = arith.constant dense<0.000000e+00> : vector<8x256xf32>
    %412 = tpu.matmul %410, %411, %cst_101 {dimension_numbers = #tpu.dot_dimension_numbers<[1], [0], [0], [1], [0, 0, 1, 1], [], []>} : vector<8x24xf32>, vector<24x256xf32>, vector<8x256xf32> -> vector<8x256xf32>
    %c0_102 = arith.constant 0 : index
    %c0_103 = arith.constant 0 : index
    %413 = vector.load %arg11[%c0_102, %c0_103] : memref<8x1xf32, #tpu.memory_space<vmem>>, vector<8x1xf32>
    %414 = vector.broadcast %413 : vector<8x1xf32> to vector<8x256xf32>
    %415 = arith.addf %412, %414 : vector<8x256xf32>
    %416 = vector.extract_strided_slice %415 {offsets = [0, 0], sizes = [8, 128], strides = [1, 1]} : vector<8x256xf32> to vector<8x128xf32>
    %c0_104 = arith.constant 0 : index
    %c0_105 = arith.constant 0 : index
    %c0_106 = arith.constant 0 : index
    %417 = vector.load %arg12[%c0_104, %c0_105, %c0_106] : memref<2x8x128xf32, #tpu.memory_space<vmem>>, vector<1x8x128xf32>
    %418 = vector.shape_cast %417 : vector<1x8x128xf32> to vector<8x128xf32>
    %419 = vector.shape_cast %416 : vector<8x128xf32> to vector<1x8x128xf32>
    tpu.vector_store %arg12[%c0_104, %c0_105, %c0_106], %419 {strides = array<i32>} : memref<2x8x128xf32, #tpu.memory_space<vmem>>, vector<1x8x128xf32>,
    %420 = vector.extract_strided_slice %415 {offsets = [0, 128], sizes = [8, 128], strides = [1, 1]} : vector<8x256xf32> to vector<8x128xf32>
    %c1_107 = arith.constant 1 : index
    %c0_108 = arith.constant 0 : index
    %c0_109 = arith.constant 0 : index
    %421 = vector.load %arg12[%c1_107, %c0_108, %c0_109] : memref<2x8x128xf32, #tpu.memory_space<vmem>>, vector<1x8x128xf32>
    %422 = vector.shape_cast %421 : vector<1x8x128xf32> to vector<8x128xf32>
    %423 = vector.shape_cast %420 : vector<8x128xf32> to vector<1x8x128xf32>
    tpu.vector_store %arg12[%c1_107, %c0_108, %c0_109], %423 {strides = array<i32>} : memref<2x8x128xf32, #tpu.memory_space<vmem>>, vector<1x8x128xf32>,
    return
  }
  func.func @transform_0(%arg0: i32) -> (i32, i32, i32) {
    %c0_i32 = arith.constant 0 : i32
    %c0_i32_0 = arith.constant 0 : i32
    %c0_i32_1 = arith.constant 0 : i32
    return %arg0, %c0_i32, %c0_i32_0 : i32, i32, i32
  }
  func.func @transform_1(%arg0: i32) -> (i32, i32) {
    %c0_i32 = arith.constant 0 : i32
    %c0_i32_0 = arith.constant 0 : i32
    %c0_i32_1 = arith.constant 0 : i32
    return %c0_i32, %c0_i32_0 : i32, i32
  }
  func.func @transform_2(%arg0: i32) -> (i32, i32) {
    %c0_i32 = arith.constant 0 : i32
    %c0_i32_0 = arith.constant 0 : i32
    %c0_i32_1 = arith.constant 0 : i32
    return %c0_i32, %c0_i32_0 : i32, i32
  }
  func.func @transform_3(%arg0: i32) -> (i32, i32) {
    %c0_i32 = arith.constant 0 : i32
    %c0_i32_0 = arith.constant 0 : i32
    %c0_i32_1 = arith.constant 0 : i32
    return %c0_i32, %c0_i32_0 : i32, i32
  }
  func.func @transform_4(%arg0: i32) -> (i32, i32, i32, i32) {
    %c0_i32 = arith.constant 0 : i32
    %c0_i32_0 = arith.constant 0 : i32
    %c0_i32_1 = arith.constant 0 : i32
    %c0_i32_2 = arith.constant 0 : i32
    %c0_i32_3 = arith.constant 0 : i32
    return %c0_i32, %c0_i32_0, %c0_i32_1, %c0_i32_2 : i32, i32, i32, i32
  }
  func.func @transform_5(%arg0: i32) -> (i32, i32, i32) {
    %c0_i32 = arith.constant 0 : i32
    %c0_i32_0 = arith.constant 0 : i32
    %c0_i32_1 = arith.constant 0 : i32
    %c0_i32_2 = arith.constant 0 : i32
    return %c0_i32, %c0_i32_0, %c0_i32_1 : i32, i32, i32
  }
  func.func @transform_6(%arg0: i32) -> (i32, i32) {
    %c0_i32 = arith.constant 0 : i32
    %c0_i32_0 = arith.constant 0 : i32
    %c0_i32_1 = arith.constant 0 : i32
    return %c0_i32, %c0_i32_0 : i32, i32
  }
  func.func @transform_7(%arg0: i32) -> (i32, i32, i32, i32) {
    %c0_i32 = arith.constant 0 : i32
    %c0_i32_0 = arith.constant 0 : i32
    %c0_i32_1 = arith.constant 0 : i32
    %c0_i32_2 = arith.constant 0 : i32
    %c0_i32_3 = arith.constant 0 : i32
    return %c0_i32, %c0_i32_0, %c0_i32_1, %c0_i32_2 : i32, i32, i32, i32
  }
  func.func @transform_8(%arg0: i32) -> (i32, i32, i32) {
    %c0_i32 = arith.constant 0 : i32
    %c0_i32_0 = arith.constant 0 : i32
    %c0_i32_1 = arith.constant 0 : i32
    %c0_i32_2 = arith.constant 0 : i32
    return %c0_i32, %c0_i32_0, %c0_i32_1 : i32, i32, i32
  }
  func.func @transform_9(%arg0: i32) -> (i32, i32) {
    %c0_i32 = arith.constant 0 : i32
    %c0_i32_0 = arith.constant 0 : i32
    %c0_i32_1 = arith.constant 0 : i32
    return %c0_i32, %c0_i32_0 : i32, i32
  }
  func.func @transform_10(%arg0: i32) -> (i32, i32) {
    %c0_i32 = arith.constant 0 : i32
    %c0_i32_0 = arith.constant 0 : i32
    %c0_i32_1 = arith.constant 0 : i32
    return %c0_i32, %c0_i32_0 : i32, i32
  }
  func.func @transform_11(%arg0: i32) -> (i32, i32, i32) {
    %c0_i32 = arith.constant 0 : i32
    %c0_i32_0 = arith.constant 0 : i32
    %c0_i32_1 = arith.constant 0 : i32
    return %arg0, %c0_i32, %c0_i32_0 : i32, i32, i32
  }
}

</mosaic_0001>

<bundles_post_ra>
// kernel: gasconv_forward.1
= control target key start
LH: loop header
LB: loop body
LE: loop exit
PB: predicated region body
PF: predicated region fallthrough
CT: control target
= control target key end

     0   :  { %v78_v0 = vlaneseq  ;;  %v1562_v3 = vmov 1983009808   ;;  %v1563_v5 = vmov 0   ;;  %vm115_vm0 = vcmask 1041408   ;;  %s1565_s23 = smov 127   ;;  %s1566_s24 = smov 118   ;;  %s2607_s0 = inlined_call_operand.vmem [shape: bf16[1,4,1024], index: 0, kind: input, shape index: {}]   ;;  %s2608_s1 = inlined_call_operand.vmem [shape: bf16[24,4], index: 1, kind: input, shape index: {}]   ;;  %s2609_s2 = inlined_call_operand.vmem [shape: f32[24,1], index: 2, kind: input, shape index: {}]   ;;  %s2610_s4 = inlined_call_operand.vmem [shape: f32[3,9,8,1], index: 4, kind: input, shape index: {}]   ;;  %s2611_s5 = inlined_call_operand.vmem [shape: f32[3,8,1], index: 5, kind: input, shape index: {}]   ;;  %s2612_s7 = inlined_call_operand.vmem [shape: f32[3,9,8,1], index: 7, kind: input, shape index: {}]   ;;  %s2613_s3 = inlined_call_operand.vmem [shape: f32[1,1024], index: 3, kind: input, shape index: {}]   ;;  %s2614_s8 = inlined_call_operand.vmem [shape: f32[3,8,1], index: 8, kind: input, shape index: {}]   ;;  %s2615_s6 = inlined_call_operand.vmem [shape: f32[1,256], index: 6, kind: input, shape index: {}]   ;;  %s2616_s10 = inlined_call_operand.vmem [shape: f32[8,1], index: 10, kind: input, shape index: {}]   ;;  %s2617_s9 = inlined_call_operand.vmem [shape: f32[8,24], index: 9, kind: input, shape index: {}]   ;;  %s2618_s11 = inlined_call_operand.vmem [shape: f32[2,8,128], index: 11, kind: output, shape index: {}]  }
   0x1   :  { %v41_v1 = vld [vmem:[%s2607_s0] sm:$0xff]  ;;  %v42_v2 = vld [vmem:[%s2607_s0 + $0x8] sm:$0xff]  ;;  %v76_v4 = vunpack.c.l.s4 %v1562_v3  ;;  %172 = vmatprep.mubr.bf16.mxu0 %v1563_v5  ;;  %223 = vmatprep.mubr.bf16.mxu1 %v1563_v5  ;;  %v507_v18 = vld [vmem:[%s2610_s4 + $0x10] sm:$0xff]  ;;  %vm108_vm1 = vcmask 31744   ;;  %s1568_s0 = smov 9   ;;  %s1569_s25 = smov 8  }
   0x2   :  { %v1642_v6 = vshrl.u32 %v78_v0, 7  ;;  %1556 = vset.pattern.permute.xlu0 %v1563_v5  ;;  %v46_v7 = vld [vmem:[%s2609_s2] sm:$0xff]  ;;  %1557 = vset.pattern.permute.xlu1 %v1563_v5  ;;  %v91_v9 = vcombine.high %v42_v2, %v42_v2  ;;  %v74_v10 = vcombine.high %v41_v1, %v41_v1  ;;  %v506_v13 = vld [vmem:[%s2610_s4 + $0x8] sm:$0xff]  ;;  %v508_v26 = vld [vmem:[%s2610_s4 + $0x18] sm:$0xff]  ;;  %s1570_s26 = smov 1   ;;  %vm1403_vm10 = vcmask 195584  }
   0x3   :  { %v77_v8 = vunpack.c.0.s8 %v76_v4  ;;  %51 = vperm.xlu0 %1556, %v46_v7   ;;  %v505_v11 = vld [vmem:[%s2610_s4] sm:$0xff]  ;;  %523 = vperm.xlu1 %1557, %v506_v13   ;;  %v510_v30 = vld [vmem:[%s2610_s4 + $0x28] sm:$0xff]  ;;  %v511_v31 = vld [vmem:[%s2610_s4 + $0x30] sm:$0xff] }
   0x4   :  { %v1560_v25 = vld [vmem:[%s2608_s1] sm:$0xff]   ;;  %v1561_v32 = vld [vmem:[%s2608_s1 + $0x8] ss:$0 sps:$4 sm:$0xff]   ;;  %v512_v34 = vld [vmem:[%s2610_s4 + $0x38] sm:$0xff]  ;;  %v443_v54 = vsub.s32 0, %v1642_v6  ;;  %v451_v55 = vsub.s32 2, %v1642_v6 }
   0x5   :  { %v80_v12 = vsub.s32 %v77_v8, %v1642_v6  ;;  %v509_v27 = vld [vmem:[%s2610_s4 + $0x20] sm:$0xff]  ;;  %v47_v33 = vld [vmem:[%s2609_s2 + $0x8] sm:$0xff]  ;;  %v1500_v40 = vld [vmem:[%s2610_s4 + $0x50] sm:$0xff]  ;;  %v447_v57 = vsub.s32 1, %v1642_v6  ;;  %v455_v58 = vsub.s32 3, %v1642_v6  ;;  %s1571_s1 = smov 120  }
   0x6   :  { %v513_v35 = vld [vmem:[%s2610_s4 + $0x40] sm:$0xff]  ;;  %v1499_v39 = vld [vmem:[%s2610_s4 + $0x48] sm:$0xff]  ;;  %v1501_v42 = vld [vmem:[%s2610_s4 + $0x58] sm:$0xff] }
   0x7   :  { %v81_v14 = vrot.slane %v41_v1, %v80_v12  ;;  %v98_v15 = vrot.slane %v42_v2, %v80_v12  ;;  %v88_v16 = vrot.slane %v74_v10, %v80_v12  ;;  %v105_v17 = vrot.slane %v91_v9, %v80_v12  ;;  %516 = vperm.xlu0 %1556, %v505_v11   ;;  %v628_v36 = vld [vmem:[%s2611_s5] sm:$0xff]  ;;  %v650_v41 = vld [vmem:[%s2612_s7 + $0x8] sm:$0xff]  ;;  %v651_v43 = vld [vmem:[%s2612_s7 + $0x10] sm:$0xff] }
   0x8   :  { %541 = vperm.xlu1 %1557, %v507_v18   ;;  %v653_v37 = vld [vmem:[%s2612_s7 + $0x20] sm:$0xff] }
   0x9   :  { %v89_v19 = vcombine.high %v81_v14, %v81_v14  ;;  %v90_v20 = vcombine.high %v88_v16, %v88_v16  ;;  %v117_v21 = vsel %vm115_vm0, %v81_v14, 0  ;;  %v123_v22 = vsel %vm115_vm0, %v88_v16, 0  ;;  %v649_v38 = vld [vmem:[%s2612_s7] sm:$0xff] }
   0xa   :  { %v106_v23 = vcombine.high %v98_v15, %v98_v15  ;;  %v107_v24 = vcombine.high %v105_v17, %v105_v17  ;;  %v129_v28 = vsel %vm115_vm0, %v98_v15, 0  ;;  %v135_v29 = vsel %vm115_vm0, %v105_v17, 0  ;;  %v1757_v56 = vld [vmem:[%s2613_s3] sm:$0xff]  ;;  %s1564_s3 = smov 119  }
   0xb   :  { %1487 = vmatprep.subr.msk.bf16.mxu0 %vm115_vm0, %v89_v19  ;;  %1490 = vmatprep.subr.msk.bf16.mxu1 %vm115_vm0, %v90_v20  ;;  %v1769_v1 = vrot.slane %v1757_v56, %v443_v54  ;;  %v1779_v8 = vrot.slane %v1757_v56, %v447_v57  ;;  %v1783_v12 = vrot.slane %v1757_v56, %v455_v58 }
   0xc   :  { %141 = vmatpush1.bf16.msra.mxu0 %v117_v21  ;;  %192 = vmatpush1.bf16.msra.mxu1 %v123_v22 }
   0xd   :  { %1493 = vmatprep.subr.msk.bf16.mxu0 %vm115_vm0, %v106_v23  ;;  %1496 = vmatprep.subr.msk.bf16.mxu1 %vm115_vm0, %v107_v24 }
   0xe   :  { %550 = vperm.xlu0 %1556, %v508_v26   ;;  %559 = vperm.xlu1 %1557, %v509_v27  }
   0xf   :  { %1488 = vmatmul.mubr.msk.bf16.vlgmr.msra.gmra.mrb[0].mxu0 %vm108_vm1, %v1560_v25  ;;  %1491 = vmatmul.mubr.msk.bf16.vlgmr.msra.gmra.mrb[0].mxu1 %vm108_vm1, %v1560_v25 }
  0x10   :  { %182 = vmatprep.mubr.bf16.mxu0 %v1563_v5  ;;  %233 = vmatprep.mubr.bf16.mxu1 %v1563_v5 }
  0x11   :  { %243 = vmatpush1.bf16.msra.mxu0 %v129_v28  ;;  %294 = vmatpush1.bf16.msra.mxu1 %v135_v29 }
  0x12   :  { %574 = vperm.xlu0 %1556, %v510_v30   ;;  %590 = vperm.xlu1 %1557, %v511_v31  }
  0x16   :  { %56 = vperm.xlu0 %1556, %v47_v33   ;;  %605 = vperm.xlu1 %1557, %v512_v34  }
  0x17   :  { %1489 = vmatmul.mubr.msk.bf16.gmra.mrb[4].mxu0 %vm108_vm1, %v1561_v32  ;;  %1492 = vmatmul.mubr.msk.bf16.gmra.mrb[4].mxu1 %vm108_vm1, %v1561_v32 }
  0x18   :  { %274 = vmatprep.mubr.bf16.mxu0 %v1563_v5  ;;  %325 = vmatprep.mubr.bf16.mxu1 %v1563_v5 }
  0x1a   :  { %621 = vperm.xlu0 %1556, %v513_v35   ;;  %631 = vperm.xlu1 %1557, %v628_v36  }
  0x1e   :  { %660 = vperm.xlu0 %1556, %v653_v37   ;;  %674 = vperm.xlu1 %1557, %v649_v38  }
  0x1f   :  { %1494 = vmatmul.mubr.msk.bf16.vlgmr.msra.gmra.mrb[8].mxu0 %vm108_vm1, %v1560_v25  ;;  %1497 = vmatmul.mubr.msk.bf16.vlgmr.msra.gmra.mrb[8].mxu1 %vm108_vm1, %v1560_v25 }
  0x20   :  { %284 = vmatprep.mubr.bf16.mxu0 %v1563_v5  ;;  %335 = vmatprep.mubr.bf16.mxu1 %v1563_v5  ;;  %v1773_v5 = vrot.slane %v1757_v56, %v451_v55 }
  0x22   :  { %822 = vperm.xlu0 %1556, %v1499_v39   ;;  %829 = vperm.xlu1 %1557, %v1500_v40  }
  0x26   :  { %690 = vperm.xlu0 %1556, %v650_v41   ;;  %844 = vperm.xlu1 %1557, %v1501_v42  }
  0x27   :  { %1495 = vmatmul.mubr.msk.bf16.gmra.mrb[12].mxu0 %vm108_vm1, %v1561_v32  ;;  %1498 = vmatmul.mubr.msk.bf16.gmra.mrb[12].mxu1 %vm108_vm1, %v1561_v32 }
  0x2a   :  { %706 = vperm.xlu0 %1556, %v651_v43  }
  0x82   :  { %v1732_v44 = vpop.permute.xlu0 %51  ;;  %v1734_v45 = vpop.permute.xlu1 %523 }
  0x86   :  { %v1736_v46 = vpop.permute.xlu0 %516 }
  0x87   :  { %v1738_v47 = vpop.permute.xlu1 %541 }
  0x8d   :  { %v1740_v48 = vpop.permute.xlu0 %550  ;;  %v1742_v49 = vpop.permute.xlu1 %559 }
  0x91   :  { %v1744_v50 = vpop.permute.xlu0 %574  ;;  %v1746_v51 = vpop.permute.xlu1 %590 }
  0x95   :  { %v1748_v52 = vpop.permute.xlu0 %56  ;;  %v1750_v53 = vpop.permute.xlu1 %605 }
  0x99   :  { %v1761_v59 = vpop.permute.xlu0 %621  ;;  %v1763_v60 = vpop.permute.xlu1 %631 }
  0x9d   :  { %v1789_v31 = vpop.permute.xlu1 %674  ;;  %v1791_v32 = vpop.permute.xlu0 %660 }
  0xe2   :  { %v174_v61 = vpop.f32.mrb[0].mxu0  ;;  %v225_v62 = vpop.f32.mrb[0].mxu1 }
  0xe3   :  { %v175_v63 = vadd.f32 %v174_v61, %v1732_v44  ;;  %v226_v2 = vadd.f32 %v225_v62, %v1732_v44  ;;  %v176_v3 = vpop.f32.mrb[1].mxu0  ;;  %v227_v4 = vpop.f32.mrb[1].mxu1 }
  0xe4   :  { %v177_v7 = vadd.f32 %v176_v3, %v1732_v44  ;;  %v228_v9 = vadd.f32 %v227_v4, %v1732_v44  ;;  %v178_v10 = vpop.f32.mrb[2].mxu0  ;;  %v229_v11 = vpop.f32.mrb[2].mxu1 }
  0xe5   :  { %v344_v13 = vadd.f32 3.0, %v175_v63  ;;  %v346_v14 = vadd.f32 3.0, %v226_v2  ;;  %v179_v15 = vadd.f32 %v178_v10, %v1748_v52  ;;  %v230_v16 = vadd.f32 %v229_v11, %v1748_v52  ;;  %v180_v17 = vpop.f32.mrb[3].mxu0  ;;  %v231_v18 = vpop.f32.mrb[3].mxu1 }
  0xe6   :  { %v345_v19 = vadd.f32 3.0, %v177_v7  ;;  %v347_v20 = vadd.f32 3.0, %v228_v9  ;;  %v181_v21 = vadd.f32 %v180_v17, %v1748_v52  ;;  %v232_v22 = vadd.f32 %v231_v18, %v1748_v52 }
  0xe7   :  { %v368_v23 = vmax.f32 %v344_v13, 0.0  ;;  %v370_v24 = vmax.f32 %v346_v14, 0.0  ;;  %v352_v25 = vadd.f32 3.0, %v179_v15  ;;  %v354_v26 = vadd.f32 3.0, %v230_v16 }
  0xe8   :  { %v369_v27 = vmax.f32 %v345_v19, 0.0  ;;  %v371_v28 = vmax.f32 %v347_v20, 0.0  ;;  %v353_v29 = vadd.f32 3.0, %v181_v21  ;;  %v355_v30 = vadd.f32 3.0, %v232_v22 }
  0xe9   :  { %v392_v33 = vmin.f32 %v368_v23, 6.0  ;;  %v394_v34 = vmin.f32 %v370_v24, 6.0  ;;  %v376_v35 = vmax.f32 %v352_v25, 0.0  ;;  %v378_v36 = vmax.f32 %v354_v26, 0.0 }
  0xea   :  { %v393_v37 = vmin.f32 %v369_v27, 6.0  ;;  %v395_v38 = vmin.f32 %v371_v28, 6.0  ;;  %v377_v39 = vmax.f32 %v353_v29, 0.0  ;;  %v379_v40 = vmax.f32 %v355_v30, 0.0  ;;  %v1793_v41 = vpop.f32.mrb[4].mxu0  ;;  %v1795_v42 = vpop.f32.mrb[4].mxu1 }
  0xeb   :  { %v416_v43 = vmul.f32 %v392_v33, %v175_v63  ;;  %v418_v55 = vmul.f32 %v394_v34, %v226_v2  ;;  %v400_v58 = vmin.f32 %v376_v35, 6.0  ;;  %v402_v61 = vmin.f32 %v378_v36, 6.0  ;;  %v1797_v62 = vpop.f32.mrb[5].mxu0  ;;  %v1799_v3 = vpop.f32.mrb[5].mxu1 }
  0xec   :  { %v417_v4 = vmul.f32 %v393_v37, %v177_v7  ;;  %v419_v10 = vmul.f32 %v395_v38, %v228_v9  ;;  %v401_v11 = vmin.f32 %v377_v39, 6.0  ;;  %v403_v13 = vmin.f32 %v379_v40, 6.0  ;;  %v188_v14 = vpop.f32.mrb[6].mxu0  ;;  %v239_v17 = vpop.f32.mrb[6].mxu1 }
  0xed   :  { %v481_v18 = vmul.f32 %v1769_v1, %v416_v43  ;;  %v424_v19 = vmul.f32 %v400_v58, %v179_v15  ;;  %v426_v20 = vmul.f32 %v402_v61, %v230_v16  ;;  %v189_v23 = vpop.f32.mrb[7].mxu0  ;;  %v240_v24 = vpop.f32.mrb[7].mxu1  ;;  %v483_v63 = vmul.f32 %v1773_v5, %v418_v55 }
  0xee   :  { %v482_v2 = vmul.f32 %v1779_v8, %v417_v4  ;;  %v425_v25 = vmul.f32 %v401_v11, %v181_v21  ;;  %v427_v26 = vmul.f32 %v403_v13, %v232_v22  ;;  %v830_v27 = vpop.permute.xlu1 %829  ;;  %v484_v7 = vmul.f32 %v1783_v12, %v419_v10  ;;  %v823_v16 = vpop.permute.xlu0 %822 }
  0xef   :  { %v1806_v9 = vmul.f32 %v1769_v1, %v424_v19  ;;  %v1809_v28 = vmul.f32 %v1773_v5, %v426_v20  ;;  %581 = vrot.lane.b32.xlu1 %v481_v18, %s1564_s3  ;;  %530 = vrot.lane.b32.xlu0 %v481_v18, %s1565_s23  ;;  %v519_v15 = vmul.f32 %v1736_v46, %v481_v18  ;;  %v459_v19 = vsub.s32 4, %v1642_v6 }
  0xf0   :  { %v1815_v21 = vmul.f32 %v1779_v8, %v425_v25  ;;  %v1818_v22 = vmul.f32 %v1783_v12, %v427_v26  ;;  %v526_v29 = vmul.f32 %v1734_v45, %v483_v63  ;;  %v520_v30 = vmul.f32 %v1736_v46, %v482_v2 }
  0xf1   :  { %v825_v33 = vmul.f32 %v823_v16, %v1806_v9  ;;  %v832_v34 = vmul.f32 %v830_v27, %v1809_v28  ;;  %v527_v35 = vmul.f32 %v1734_v45, %v484_v7  ;;  %v463_v20 = vsub.s32 5, %v1642_v6 }
  0xf2   :  { %v826_v36 = vmul.f32 %v823_v16, %v1815_v21  ;;  %v833_v37 = vmul.f32 %v830_v27, %v1818_v22  ;;  %v276_v38 = vpop.f32.mrb[8].mxu0  ;;  %v1827_v39 = vpop.f32.mrb[8].mxu1  ;;  %v1829_v40 = vadd.f32 %v526_v29, %v519_v15  ;;  %v1852_v25 = vrot.slane %v1757_v56, %v459_v19 }
  0xf3   :  { %v1831_v43 = vadd.f32 %v832_v34, %v825_v33  ;;  %v277_v55 = vadd.f32 %v276_v38, %v1732_v44  ;;  %v278_v46 = vpop.f32.mrb[9].mxu0  ;;  %612 = vrot.lane.b32.xlu0 %v481_v18, %s1566_s24  ;;  %v1835_v58 = vpop.f32.mrb[9].mxu1  ;;  %597 = vrot.lane.b32.xlu1 %v483_v63, %s1564_s3  ;;  %v1843_v11 = vadd.f32 %v527_v35, %v520_v30  ;;  %v652_v33 = vld [vmem:[%s2612_s7 + $0x18] sm:$0xff]  ;;  %v1503_v34 = vld [vmem:[%s2610_s4 + $0x68] sm:$0xff] }
  0xf4   :  { %v1838_v45 = vadd.f32 %v833_v37, %v826_v36  ;;  %v279_v61 = vadd.f32 %v278_v46, %v1732_v44  ;;  %v280_v4 = vpop.f32.mrb[10].mxu0  ;;  %v1841_v10 = vpop.f32.mrb[10].mxu1  ;;  %v1855_v27 = vrot.slane %v1757_v56, %v463_v20  ;;  %v655_v35 = vld [vmem:[%s2612_s7 + $0x30] sm:$0xff]  ;;  %v656_v37 = vld [vmem:[%s2612_s7 + $0x38] sm:$0xff] }
  0xf5   :  { %v348_v13 = vadd.f32 3.0, %v277_v55  ;;  %v282_v14 = vpop.f32.mrb[11].mxu0  ;;  %v1845_v17 = vpop.f32.mrb[11].mxu1  ;;  %v1504_v36 = vld [vmem:[%s2610_s4 + $0x70] sm:$0xff]  ;;  %v1505_v38 = vld [vmem:[%s2610_s4 + $0x78] sm:$0xff] }
  0xf6   :  { %v349_v18 = vadd.f32 3.0, %v279_v61 }
  0xf7   :  { %v372_v23 = vmax.f32 %v348_v13, 0.0  ;;  %583 = vrot.lane.b32.xlu0 %v482_v2, %s1564_s3  ;;  %532 = vrot.lane.b32.xlu1 %v482_v2, %s1565_s23 }
  0xf8   :  { %v373_v24 = vmax.f32 %v349_v18, 0.0  ;;  %v1506_v18 = vld [vmem:[%s2610_s4 + $0x80] sm:$0xff] }
  0xf9   :  { %v396_v63 = vmin.f32 %v372_v23, 6.0 }
  0xfa   :  { %v397_v26 = vmin.f32 %v373_v24, 6.0  ;;  %v1899_v46 = vpop.f32.mrb[12].mxu1 }
  0xfb   :  { %v420_v15 = vmul.f32 %v396_v63, %v277_v55  ;;  %599 = vrot.lane.b32.xlu0 %v484_v7, %s1564_s3  ;;  %614 = vrot.lane.b32.xlu1 %v482_v2, %s1566_s24  ;;  %v1502_v2 = vld [vmem:[%s2610_s4 + $0x60] sm:$0xff]  ;;  %v654_v7 = vld [vmem:[%s2612_s7 + $0x28] sm:$0xff]  ;;  %v1897_v55 = vpop.f32.mrb[12].mxu0  ;;  %v1906_v19 = vpop.f32.mrb[13].mxu1 }
  0xfc   :  { %v421_v16 = vmul.f32 %v397_v26, %v279_v61  ;;  %v48_v61 = vld [vmem:[%s2609_s2 + $0x10] sm:$0xff]  ;;  %v1904_v13 = vpop.f32.mrb[13].mxu0  ;;  %v341_v23 = vpop.f32.mrb[14].mxu1  ;;  %v1507_v26 = vld [vmem:[%s2610_s4 + $0x88] sm:$0xff] }
  0xfd   :  { %v1860_v29 = vmul.f32 %v1852_v25, %v420_v15  ;;  %v290_v20 = vpop.f32.mrb[14].mxu0  ;;  %v342_v63 = vpop.f32.mrb[15].mxu1  ;;  %v657_v15 = vld [vmem:[%s2612_s7 + $0x40] sm:$0xff] }
  0xfe   :  { %v1863_v30 = vmul.f32 %v1855_v27, %v421_v16  ;;  %v291_v24 = vpop.f32.mrb[15].mxu0  ;;  %v281_v16 = vadd.f32 %v280_v4, %v1748_v52  ;;  %v1959_v23 = vpop.permute.xlu0 %690  ;;  %v330_v63 = vadd.f32 %v1835_v58, %v1732_v44 }
  0xff   :  { %566 = vrot.lane.b32.xlu0 %v1860_v29, %s1565_s23  ;;  %v328_v24 = vadd.f32 %v1827_v39, %v1732_v44 }
 0x100   :  { %568 = vrot.lane.b32.xlu1 %v1863_v30, %s1565_s23 }
 0x103   :  { %722 = vperm.xlu0 %1556, %v652_v33   ;;  %v790_v33 = vld [vmem:[%s2614_s8] sm:$0xff] }
 0x104   :  { %853 = vperm.xlu1 %1557, %v1502_v2   ;;  %v283_v2 = vadd.f32 %v282_v14, %v1748_v52 }
 0x107   :  { %737 = vperm.xlu0 %1556, %v654_v7   ;;  %v1508_v7 = vld [vmem:[%s2611_s5 + $0x8] sm:$0xff] }
 0x108   :  { %862 = vperm.xlu1 %1557, %v1503_v34   ;;  %v356_v34 = vadd.f32 3.0, %v281_v16 }
 0x10a   :  { %v380_v4 = vmax.f32 %v356_v34, 0.0 }
 0x10b   :  { %838 = vrot.lane.b32.xlu0 %v1815_v21, %s1565_s23 }
 0x10c   :  { %836 = vrot.lane.b32.xlu1 %v1806_v9, %s1565_s23  ;;  %v404_v14 = vmin.f32 %v380_v4, 6.0  ;;  %v467_v4 = vsub.s32 6, %v1642_v6 }
 0x10f   :  { %753 = vperm.xlu0 %1556, %v655_v35   ;;  %v357_v35 = vadd.f32 3.0, %v283_v2 }
 0x110   :  { %877 = vperm.xlu1 %1557, %v1504_v36  }
 0x111   :  { %v381_v36 = vmax.f32 %v357_v35, 0.0 }
 0x113   :  { %768 = vperm.xlu0 %1556, %v656_v37   ;;  %v1513_v37 = vld [vmem:[%s2612_s7 + $0x68] sm:$0xff] }
 0x114   :  { %892 = vperm.xlu1 %1557, %v1505_v38   ;;  %v405_v38 = vmin.f32 %v381_v36, 6.0  ;;  %v1971_v36 = vand.u32 127, %v78_v0 }
 0x116   :  { %vm536_vm2 = vcmp.lt.s32.totalorder %v1971_v36, 127  ;;  %vm585_vm3 = vcmp.lt.s32.totalorder %v1971_v36, 119  ;;  %vm616_vm4 = vcmp.lt.s32.totalorder %v1971_v36, 118  ;;  %vm669_vm5 = vcmp.lt.s32.totalorder %v1971_v36, 10 }
 0x117   :  { %61 = vperm.xlu0 %1556, %v48_v61   ;;  %v429_v61 = vmul.f32 %v405_v38, %v283_v2  ;;  %vm685_vm6 = vcmp.lt.s32.totalorder %v1971_v36, 9  ;;  %vm701_vm7 = vcmp.lt.s32.totalorder %v1971_v36, 8  ;;  %vm717_vm8 = vcmp.lt.s32.totalorder %v1971_v36, 1 }
 0x118   :  { %907 = vperm.xlu1 %1557, %v1506_v18   ;;  %vm748_vm9 = vcmp.lt.s32.totalorder %v1971_v36, 120 }
 0x119   :  { %v1953_v20 = vmul.f32 %v1855_v27, %v429_v61 }
 0x11b   :  { %922 = vperm.xlu0 %1556, %v1507_v26   ;;  %v350_v26 = vadd.f32 3.0, %v328_v24 }
 0x11c   :  { %783 = vperm.xlu1 %1557, %v657_v15   ;;  %v351_v15 = vadd.f32 3.0, %v330_v63 }
 0x11d   :  { %v374_v2 = vmax.f32 %v350_v26, 0.0 }
 0x11f   :  { %886 = vrot.lane.b32.xlu0 %v1815_v21, %s1564_s3 }
 0x120   :  { %884 = vrot.lane.b32.xlu1 %v1806_v9, %s1564_s3 }
 0x123   :  { %899 = vrot.lane.b32.xlu0 %v1809_v28, %s1564_s3  ;;  %v1509_v28 = vld [vmem:[%s2612_s7 + $0x48] sm:$0xff] }
 0x124   :  { %793 = vperm.xlu1 %1557, %v790_v33   ;;  %v1967_v33 = vpop.permute.xlu1 %844 }
 0x127   :  { %933 = vperm.xlu0 %1556, %v1508_v7   ;;  %v375_v7 = vmax.f32 %v351_v15, 0.0 }
 0x128   :  { %901 = vrot.lane.b32.xlu1 %v1818_v22, %s1564_s3  ;;  %v1520_v22 = vld [vmem:[%s2610_s4 + $0x98] sm:$0xff] }
 0x129   :  { %v399_v39 = vmin.f32 %v375_v7, 6.0  ;;  %v554_v7 = vmul.f32 %v1740_v48, %v1863_v30 }
 0x12b   :  { %916 = vrot.lane.b32.xlu0 %v1815_v21, %s1566_s24  ;;  %v428_v21 = vmul.f32 %v404_v14, %v281_v16  ;;  %v1965_v16 = vpop.permute.xlu0 %706  ;;  %v471_v14 = vsub.s32 7, %v1642_v6 }
 0x12c   :  { %914 = vrot.lane.b32.xlu1 %v1806_v9, %s1566_s24  ;;  %v1519_v9 = vld [vmem:[%s2610_s4 + $0x90] sm:$0xff] }
 0x12d   :  { %v1950_v18 = vmul.f32 %v1852_v25, %v428_v21  ;;  %v1978_v21 = vrot.slane %v1757_v56, %v471_v14 }
 0x12f   :  { %967 = vperm.xlu0 %1556, %v1509_v28   ;;  %v398_v28 = vmin.f32 %v374_v2, 6.0 }
 0x130   :  { %954 = vperm.xlu1 %1557, %v1513_v37   ;;  %v1975_v37 = vrot.slane %v1757_v56, %v467_v4  ;;  %v553_v56 = vmul.f32 %v1740_v48, %v1860_v29 }
 0x131   :  { %v422_v38 = vmul.f32 %v398_v28, %v328_v24 }
 0x133   :  { %1119 = vperm.xlu0 %1556, %v1520_v22   ;;  %v423_v22 = vmul.f32 %v399_v39, %v330_v63  ;;  %v487_v15 = vmul.f32 %v1975_v37, %v422_v38 }
 0x134   :  { %1112 = vperm.xlu1 %1557, %v1519_v9  }
 0x135   :  { %v488_v2 = vmul.f32 %v1978_v21, %v423_v22  ;;  %v562_v14 = vmul.f32 %v1742_v49, %v487_v15 }
 0x137   :  { %869 = vrot.lane.b32.xlu0 %v1950_v18, %s1565_s23  ;;  %v563_v38 = vmul.f32 %v1742_v49, %v488_v2 }
 0x138   :  { %871 = vrot.lane.b32.xlu1 %v1953_v20, %s1565_s23 }
 0x161   :  { %v582_v34 = vpop.permute.xlu1 %581  ;;  %v531_v35 = vpop.permute.xlu0 %530 }
 0x165   :  { %v613_v44 = vpop.permute.xlu0 %612  ;;  %v598_v58 = vpop.permute.xlu1 %597 }
 0x169   :  { %v584_v9 = vpop.permute.xlu0 %583  ;;  %v533_v61 = vpop.permute.xlu1 %532 }
 0x16a   :  { %v537_v0 = vsel %vm536_vm2, %v531_v35, %v533_v61  ;;  %v538_v26 = vsel %vm536_vm2, %v533_v61, %v531_v35  ;;  %v586_v48 = vsel %vm585_vm3, %v582_v34, %v584_v9 }
 0x16b   :  { %v544_v24 = vmul.f32 %v1738_v47, %v537_v0  ;;  %v545_v63 = vmul.f32 %v1738_v47, %v538_v26 }
 0x16d   :  { %v546_v4 = vadd.f32 %v544_v24, %v1829_v40  ;;  %v547_v28 = vadd.f32 %v545_v63, %v1843_v11  ;;  %v600_v39 = vpop.permute.xlu0 %599  ;;  %v615_v35 = vpop.permute.xlu1 %614  ;;  %v587_v40 = vsel %vm585_vm3, %v584_v9, %v582_v34  ;;  %v593_v34 = vmul.f32 %v1746_v51, %v586_v48 }
 0x16e   :  { %v601_v2 = vsel %vm585_vm3, %v598_v58, %v600_v39  ;;  %v602_v24 = vsel %vm585_vm3, %v600_v39, %v598_v58  ;;  %v594_v9 = vmul.f32 %v1746_v51, %v587_v40  ;;  %v40_v58 = vld [vmem:[%s2615_s6] sm:$0x3]  ;;  %v332_v51 = vadd.f32 %v1841_v10, %v1748_v52  ;;  %s1567_s6 = smov 10  }
 0x16f   :  { %v555_v22 = vadd.f32 %v553_v56, %v546_v4  ;;  %v556_v61 = vadd.f32 %v554_v7, %v547_v28  ;;  %v617_v7 = vsel %vm616_vm4, %v613_v44, %v615_v35  ;;  %v618_v4 = vsel %vm616_vm4, %v615_v35, %v613_v44 }
 0x170   :  { %v609_v28 = vmul.f32 %v1750_v53, %v602_v24  ;;  %v334_v39 = vadd.f32 %v1845_v17, %v1748_v52  ;;  %v625_v44 = vmul.f32 %v1761_v59, %v618_v4  ;;  %v358_v10 = vadd.f32 3.0, %v332_v51 }
 0x171   :  { %v567_v47 = vpop.permute.xlu0 %566  ;;  %v565_v0 = vadd.f32 %v563_v38, %v556_v61  ;;  %v564_v29 = vadd.f32 %v562_v14, %v555_v22  ;;  %v624_v22 = vmul.f32 %v1761_v59, %v617_v7 }
 0x172   :  { %v569_v26 = vpop.permute.xlu1 %568 }
 0x173   :  { %v570_v11 = vsel %vm536_vm2, %v567_v47, %v569_v26  ;;  %v571_v49 = vsel %vm536_vm2, %v569_v26, %v567_v47  ;;  %v2036_v47 = vrot.slane %v40_v58, %v447_v57  ;;  %v359_v26 = vadd.f32 3.0, %v334_v39 }
 0x174   :  { %v577_v30 = vmul.f32 %v1744_v50, %v570_v11  ;;  %v578_v15 = vmul.f32 %v1744_v50, %v571_v49  ;;  %v608_v50 = vmul.f32 %v1750_v53, %v601_v2  ;;  %v2032_v53 = vrot.slane %v40_v58, %v443_v54 }
 0x175   :  { %v382_v54 = vmax.f32 %v358_v10, 0.0  ;;  %v383_v40 = vmax.f32 %v359_v26, 0.0 }
 0x176   :  { %v579_v63 = vadd.f32 %v577_v30, %v564_v29  ;;  %v580_v56 = vadd.f32 %v578_v15, %v565_v0 }
 0x177   :  { %v406_v57 = vmin.f32 %v382_v54, 6.0 }
 0x178   :  { %v595_v14 = vadd.f32 %v593_v34, %v579_v63  ;;  %v596_v38 = vadd.f32 %v594_v9, %v580_v56 }
 0x179   :  { %v430_v15 = vmul.f32 %v406_v57, %v332_v51 }
 0x17a   :  { %v610_v35 = vadd.f32 %v608_v50, %v595_v14  ;;  %v611_v61 = vadd.f32 %v609_v28, %v596_v38 }
 0x17b   :  { %v495_v4 = vmul.f32 %v1975_v37, %v430_v15 }
 0x17c   :  { %v626_v0 = vadd.f32 %v624_v22, %v610_v35  ;;  %v627_v29 = vadd.f32 %v625_v44, %v611_v61 }
 0x17e   :  { %v634_v52 = vadd.f32 %v1763_v60, %v626_v0  ;;  %v635_v17 = vadd.f32 %v1763_v60, %v627_v29  ;;  %v407_v60 = vmin.f32 %v383_v40, 6.0 }
 0x180   :  { %v2041_v59 = vmul.f32 %v2032_v53, %v634_v52  ;;  %v2044_v48 = vmul.f32 %v2036_v47, %v635_v17  ;;  %v431_v2 = vmul.f32 %v407_v60, %v334_v39 }
 0x182   :  { %v2046_v11 = vpop.permute.xlu0 %722  ;;  %667 = vrot.lane.b32.xlu1 %v2044_v48, %s1567_s6  ;;  %665 = vrot.lane.b32.xlu0 %v2041_v59, %s1567_s6  ;;  %v496_v50 = vmul.f32 %v1978_v21, %v431_v2 }
 0x183   :  { %v854_v6 = vpop.permute.xlu1 %853 }
 0x184   :  { %v856_v14 = vmul.f32 %v854_v6, %v1950_v18  ;;  %v857_v38 = vmul.f32 %v854_v6, %v1953_v20 }
 0x186   :  { %v2052_v49 = vpop.permute.xlu0 %737  ;;  %683 = vrot.lane.b32.xlu1 %v2044_v48, %s1568_s0  ;;  %681 = vrot.lane.b32.xlu0 %v2041_v59, %s1568_s0 }
 0x187   :  { %v863_v30 = vpop.permute.xlu1 %862 }
 0x188   :  { %v865_v39 = vmul.f32 %v863_v30, %v495_v4  ;;  %v866_v22 = vmul.f32 %v863_v30, %v496_v50 }
 0x18a   :  { %v839_v24 = vpop.permute.xlu0 %838  ;;  %699 = vrot.lane.b32.xlu1 %v2044_v48, %s1569_s25  ;;  %697 = vrot.lane.b32.xlu0 %v2041_v59, %s1569_s25 }
 0x18b   :  { %v837_v34 = vpop.permute.xlu1 %836 }
 0x18c   :  { %v840_v9 = vsel %vm536_vm2, %v837_v34, %v839_v24  ;;  %v841_v63 = vsel %vm536_vm2, %v839_v24, %v837_v34  ;;  %v1511_v24 = vld [vmem:[%s2612_s7 + $0x58] sm:$0xff]  ;;  %v1522_v34 = vld [vmem:[%s2610_s4 + $0xa8] sm:$0xff] }
 0x18d   :  { %v847_v56 = vmul.f32 %v1967_v33, %v840_v9  ;;  %v848_v7 = vmul.f32 %v1967_v33, %v841_v63 }
 0x18e   :  { %v2070_v28 = vpop.permute.xlu0 %753  ;;  %715 = vrot.lane.b32.xlu1 %v2044_v48, %s1570_s26  ;;  %713 = vrot.lane.b32.xlu0 %v2041_v59, %s1570_s26 }
 0x18f   :  { %v849_v58 = vadd.f32 %v847_v56, %v1831_v43  ;;  %v850_v33 = vadd.f32 %v848_v7, %v1838_v45  ;;  %v2080_v51 = vpop.permute.xlu1 %877 }
 0x191   :  { %v858_v44 = vadd.f32 %v856_v14, %v849_v58  ;;  %v859_v35 = vadd.f32 %v857_v38, %v850_v33  ;;  %v1512_v14 = vld [vmem:[%s2612_s7 + $0x60] sm:$0xff]  ;;  %v1523_v38 = vld [vmem:[%s2610_s4 + $0xb0] sm:$0xff] }
 0x192   :  { %v2082_v61 = vpop.permute.xlu0 %768  ;;  %729 = vrot.lane.b32.xlu1 %v2041_v59, %s1565_s23  ;;  %731 = vrot.lane.b32.xlu0 %v2044_v48, %s1565_s23 }
 0x193   :  { %v2088_v18 = vpop.permute.xlu1 %892  ;;  %v2090_v20 = vadd.f32 %v865_v39, %v858_v44  ;;  %v2092_v43 = vadd.f32 %v866_v22, %v859_v35 }
 0x196   :  { %v2094_v45 = vpop.permute.xlu0 %61  ;;  %744 = vrot.lane.b32.xlu1 %v2041_v59, %s1571_s1  ;;  %746 = vrot.lane.b32.xlu0 %v2044_v48, %s1571_s1 }
 0x197   :  { %v2100_v0 = vpop.permute.xlu1 %907  ;;  %v185_v29 = vadd.f32 %v1793_v41, %v2094_v45  ;;  %v187_v17 = vadd.f32 %v1797_v62, %v2094_v45  ;;  %v236_v54 = vadd.f32 %v1795_v42, %v2094_v45  ;;  %v238_v41 = vadd.f32 %v1799_v3, %v2094_v45  ;;  %v1510_v62 = vld [vmem:[%s2612_s7 + $0x50] sm:$0xff]  ;;  %v1521_v42 = vld [vmem:[%s2610_s4 + $0xa0] sm:$0xff] }
 0x198   :  { %v287_v39 = vadd.f32 %v1897_v55, %v2094_v45  ;;  %v289_v55 = vadd.f32 %v1904_v13, %v2094_v45 }
 0x199   :  { %v360_v52 = vadd.f32 3.0, %v185_v29  ;;  %v361_v3 = vadd.f32 3.0, %v187_v17  ;;  %v362_v60 = vadd.f32 3.0, %v236_v54  ;;  %v363_v30 = vadd.f32 3.0, %v238_v41 }
 0x19a   :  { %v2104_v10 = vpop.permute.xlu0 %922  ;;  %760 = vrot.lane.b32.xlu1 %v2041_v59, %s1564_s3  ;;  %762 = vrot.lane.b32.xlu0 %v2044_v48, %s1564_s3 }
 0x19b   :  { %v2110_v26 = vpop.permute.xlu1 %783  ;;  %v384_v57 = vmax.f32 %v360_v52, 0.0  ;;  %v385_v63 = vmax.f32 %v361_v3, 0.0  ;;  %v386_v56 = vmax.f32 %v362_v60, 0.0  ;;  %v387_v7 = vmax.f32 %v363_v30, 0.0 }
 0x19d   :  { %v408_v9 = vmin.f32 %v384_v57, 6.0  ;;  %v409_v33 = vmin.f32 %v385_v63, 6.0  ;;  %v410_v22 = vmin.f32 %v386_v56, 6.0  ;;  %v411_v44 = vmin.f32 %v387_v7, 6.0 }
 0x19e   :  { %v2118_v40 = vpop.permute.xlu0 %886  ;;  %775 = vrot.lane.b32.xlu1 %v2041_v59, %s1566_s24  ;;  %777 = vrot.lane.b32.xlu0 %v2044_v48, %s1566_s24  ;;  %v364_v57 = vadd.f32 3.0, %v287_v39 }
 0x19f   :  { %v2124_v6 = vpop.permute.xlu1 %884  ;;  %v432_v58 = vmul.f32 %v408_v9, %v185_v29  ;;  %v433_v29 = vmul.f32 %v409_v33, %v187_v17  ;;  %v434_v3 = vmul.f32 %v410_v22, %v236_v54  ;;  %v435_v60 = vmul.f32 %v411_v44, %v238_v41  ;;  %v1516_v44 = vld [vmem:[%s2612_s7 + $0x80] sm:$0xff] }
 0x1a0   :  { %v365_v9 = vadd.f32 3.0, %v289_v55 }
 0x1a1   :  { %v2176_v17 = vmul.f32 %v1779_v8, %v433_v29  ;;  %v499_v13 = vmul.f32 %v1773_v5, %v434_v3  ;;  %v500_v54 = vmul.f32 %v1783_v12, %v435_v60  ;;  %v1525_v8 = vld [vmem:[%s2610_s4 + $0xc0] sm:$0xff]  ;;  %v1517_v3 = vld [vmem:[%s2612_s7 + $0x88] sm:$0xff] }
 0x1a2   :  { %v2132_v15 = vpop.permute.xlu0 %899  ;;  %982 = vperm.xlu1 %1557, %v1510_v62   ;;  %1134 = vperm.xlu0 %1556, %v1521_v42   ;;  %v1514_v62 = vld [vmem:[%s2612_s7 + $0x70] sm:$0xff]  ;;  %v2162_v42 = vmul.f32 %v1769_v1, %v432_v58  ;;  %v1524_v1 = vld [vmem:[%s2610_s4 + $0xb8] sm:$0xff]  ;;  %v389_v58 = vmax.f32 %v365_v9, 0.0 }
 0x1a3   :  { %v2134_v2 = vpop.permute.xlu1 %793 }
 0x1a6   :  { %v2142_v4 = vpop.permute.xlu0 %933  ;;  %997 = vperm.xlu1 %1557, %v1511_v24   ;;  %1143 = vperm.xlu0 %1556, %v1522_v34   ;;  %v388_v34 = vmax.f32 %v364_v57, 0.0  ;;  %v413_v57 = vmin.f32 %v389_v58, 6.0 }
 0x1a7   :  { %v2144_v50 = vpop.permute.xlu1 %901 }
 0x1aa   :  { %v2154_v35 = vpop.permute.xlu0 %916  ;;  %1012 = vperm.xlu1 %1557, %v1512_v14   ;;  %1152 = vperm.xlu0 %1556, %v1523_v38   ;;  %v1515_v14 = vld [vmem:[%s2612_s7 + $0x78] sm:$0xff]  ;;  %v412_v38 = vmin.f32 %v388_v34, 6.0  ;;  %v1527_v34 = vld [vmem:[%s2610_s4 + $0xd0] sm:$0xff] }
 0x1ab   :  { %v2156_v52 = vpop.permute.xlu1 %914 }
 0x1ac   :  { %v436_v29 = vmul.f32 %v412_v38, %v287_v39 }
 0x1ae   :  { %v2166_v30 = vpop.permute.xlu0 %967  ;;  %1027 = vperm.xlu1 %1557, %v1514_v62   ;;  %1126 = vrot.lane.b32.xlu0 %v2162_v42, %s1565_s23  ;;  %v1526_v62 = vld [vmem:[%s2610_s4 + $0xc8] sm:$0xff]  ;;  %v2204_v60 = vmul.f32 %v1852_v25, %v436_v29 }
 0x1af   :  { %v2170_v24 = vpop.permute.xlu1 %954  ;;  %v1518_v25 = vld [vmem:[%s2614_s8 + $0x8] sm:$0xff] }
 0x1b2   :  { %v1120_v41 = vpop.permute.xlu0 %1119  ;;  %1128 = vrot.lane.b32.xlu1 %v2176_v17, %s1565_s23  ;;  %1167 = vperm.xlu0 %1556, %v1524_v1   ;;  %v437_v1 = vmul.f32 %v413_v57, %v289_v55 }
 0x1b3   :  { %v1122_v63 = vmul.f32 %v1120_v41, %v499_v13  ;;  %v1123_v56 = vmul.f32 %v1120_v41, %v500_v54  ;;  %v1113_v7 = vpop.permute.xlu1 %1112 }
 0x1b4   :  { %v1115_v5 = vmul.f32 %v1113_v7, %v2162_v42  ;;  %v1116_v12 = vmul.f32 %v1113_v7, %v2176_v17  ;;  %v2212_v39 = vmul.f32 %v1855_v27, %v437_v1  ;;  %v1528_v27 = vld [vmem:[%s2611_s5 + $0x10] sm:$0xff]  ;;  %v904_v1 = vsel %vm585_vm3, %v2144_v50, %v2132_v15 }
 0x1b6   :  { %v2190_v33 = vadd.f32 %v1122_v63, %v1115_v5  ;;  %v2192_v22 = vadd.f32 %v1123_v56, %v1116_v12  ;;  %1042 = vperm.xlu1 %1557, %v1515_v14   ;;  %1182 = vperm.xlu0 %1556, %v1525_v8   ;;  %v870_v55 = vpop.permute.xlu0 %869 }
 0x1b7   :  { %v872_v9 = vpop.permute.xlu1 %871 }
 0x1b8   :  { %v873_v14 = vsel %vm536_vm2, %v870_v55, %v872_v9  ;;  %v874_v8 = vsel %vm536_vm2, %v872_v9, %v870_v55 }
 0x1b9   :  { %v881_v12 = vmul.f32 %v2080_v51, %v874_v8 }
 0x1ba   :  { %1057 = vperm.xlu1 %1557, %v1516_v44   ;;  %1197 = vperm.xlu0 %1556, %v1526_v62   ;;  %v664_v44 = vmul.f32 %v1791_v32, %v2044_v48  ;;  %v663_v62 = vmul.f32 %v1791_v32, %v2041_v59  ;;  %v903_v59 = vsel %vm585_vm3, %v2132_v15, %v2144_v50 }
 0x1be   :  { %1072 = vperm.xlu1 %1557, %v1517_v3   ;;  %1159 = vrot.lane.b32.xlu0 %v2204_v60, %s1565_s23  ;;  %v889_v3 = vsel %vm585_vm3, %v2118_v40, %v2124_v6 }
 0x1c2   :  { %1161 = vrot.lane.b32.xlu1 %v2212_v39, %s1565_s23  ;;  %1212 = vperm.xlu0 %1556, %v1527_v34  }
 0x1c6   :  { %1174 = vrot.lane.b32.xlu1 %v2162_v42, %s1564_s3  ;;  %1176 = vrot.lane.b32.xlu0 %v2176_v17, %s1564_s3 }
 0x1ca   :  { %1083 = vperm.xlu1 %1557, %v1518_v25   ;;  %1189 = vrot.lane.b32.xlu0 %v499_v13, %s1564_s3  ;;  %v883_v25 = vadd.f32 %v881_v12, %v2092_v43  ;;  %v911_v43 = vmul.f32 %v2100_v0, %v904_v1 }
 0x1ce   :  { %1191 = vrot.lane.b32.xlu1 %v500_v54, %s1564_s3  ;;  %1223 = vperm.xlu0 %1556, %v1528_v27   ;;  %v880_v54 = vmul.f32 %v2080_v51, %v873_v14  ;;  %v888_v51 = vsel %vm585_vm3, %v2124_v6, %v2118_v40 }
 0x1cf   :  { %v895_v9 = vmul.f32 %v2088_v18, %v888_v51 }
 0x1d0   :  { %v882_v6 = vadd.f32 %v880_v54, %v2090_v20  ;;  %v910_v20 = vmul.f32 %v2100_v0, %v903_v59 }
 0x1f4   :  { %v668_v41 = vpop.permute.xlu1 %667  ;;  %v666_v63 = vpop.permute.xlu0 %665 }
 0x1f5   :  { %v670_v38 = vsel %vm669_vm5, %v666_v63, %v668_v41  ;;  %v671_v58 = vsel %vm669_vm5, %v668_v41, %v666_v63  ;;  %v896_v41 = vmul.f32 %v2088_v18, %v889_v3 }
 0x1f6   :  { %v677_v34 = vmul.f32 %v1789_v31, %v671_v58  ;;  %v678_v40 = vmul.f32 %v1789_v31, %v670_v38 }
 0x1f8   :  { %v684_v56 = vpop.permute.xlu1 %683  ;;  %v682_v7 = vpop.permute.xlu0 %681  ;;  %v679_v14 = vadd.f32 %v677_v34, %v663_v62  ;;  %v680_v8 = vadd.f32 %v678_v40, %v664_v44 }
 0x1f9   :  { %v686_v48 = vsel %vm685_vm6, %v682_v7, %v684_v56  ;;  %v687_v32 = vsel %vm685_vm6, %v684_v56, %v682_v7 }
 0x1fa   :  { %v693_v15 = vmul.f32 %v1959_v23, %v687_v32  ;;  %v694_v50 = vmul.f32 %v1959_v23, %v686_v48  ;;  %v898_v23 = vadd.f32 %v896_v41, %v883_v25 }
 0x1fc   :  { %v700_v13 = vpop.permute.xlu1 %699  ;;  %v698_v5 = vpop.permute.xlu0 %697  ;;  %v695_v12 = vadd.f32 %v693_v15, %v679_v14  ;;  %v696_v38 = vadd.f32 %v694_v50, %v680_v8  ;;  %v913_v34 = vadd.f32 %v911_v43, %v898_v23 }
 0x1fd   :  { %v702_v27 = vsel %vm701_vm7, %v698_v5, %v700_v13  ;;  %v703_v55 = vsel %vm701_vm7, %v700_v13, %v698_v5  ;;  %v897_v5 = vadd.f32 %v895_v9, %v882_v6 }
 0x1fe   :  { %v709_v18 = vmul.f32 %v1965_v16, %v703_v55  ;;  %v710_v13 = vmul.f32 %v1965_v16, %v702_v27  ;;  %v918_v16 = vsel %vm616_vm4, %v2156_v52, %v2154_v35 }
 0x1ff   :  { %v912_v1 = vadd.f32 %v910_v20, %v897_v5  ;;  %v925_v55 = vmul.f32 %v2104_v10, %v918_v16 }
 0x200   :  { %v716_v29 = vpop.permute.xlu1 %715  ;;  %v714_v57 = vpop.permute.xlu0 %713  ;;  %v711_v48 = vadd.f32 %v709_v18, %v695_v12 }
 0x201   :  { %v718_v56 = vsel %vm717_vm8, %v714_v57, %v716_v29  ;;  %v719_v7 = vsel %vm717_vm8, %v716_v29, %v714_v57  ;;  %v919_v57 = vsel %vm616_vm4, %v2154_v35, %v2156_v52  ;;  %v927_v20 = vadd.f32 %v925_v55, %v912_v1 }
 0x202   :  { %v725_v58 = vmul.f32 %v2046_v11, %v719_v7  ;;  %v726_v29 = vmul.f32 %v2046_v11, %v718_v56  ;;  %v712_v11 = vadd.f32 %v710_v13, %v696_v38  ;;  %v926_v9 = vmul.f32 %v2104_v10, %v919_v57 }
 0x204   :  { %v730_v63 = vpop.permute.xlu1 %729  ;;  %v732_v31 = vpop.permute.xlu0 %731  ;;  %v727_v40 = vadd.f32 %v725_v58, %v711_v48  ;;  %v728_v6 = vadd.f32 %v726_v29, %v712_v11 }
 0x205   :  { %v733_v54 = vsel %vm536_vm2, %v730_v63, %v732_v31  ;;  %v734_v0 = vsel %vm536_vm2, %v732_v31, %v730_v63 }
 0x206   :  { %v740_v32 = vmul.f32 %v2052_v49, %v733_v54  ;;  %v741_v59 = vmul.f32 %v2052_v49, %v734_v0  ;;  %v340_v54 = vadd.f32 %v1906_v19, %v2094_v45  ;;  %v936_v0 = vadd.f32 %v2142_v4, %v927_v20 }
 0x208   :  { %v745_v62 = vpop.permute.xlu1 %744  ;;  %v747_v44 = vpop.permute.xlu0 %746  ;;  %v742_v15 = vadd.f32 %v740_v32, %v727_v40  ;;  %v743_v50 = vadd.f32 %v741_v59, %v728_v6  ;;  %v367_v16 = vadd.f32 3.0, %v340_v54 }
 0x209   :  { %v749_v51 = vsel %vm748_vm9, %v745_v62, %v747_v44  ;;  %v750_v3 = vsel %vm748_vm9, %v747_v44, %v745_v62 }
 0x20a   :  { %v756_v25 = vmul.f32 %v2070_v28, %v749_v51  ;;  %v757_v35 = vmul.f32 %v2070_v28, %v750_v3  ;;  %v928_v28 = vadd.f32 %v926_v9, %v913_v34  ;;  %v391_v51 = vmax.f32 %v367_v16, 0.0 }
 0x20c   :  { %v761_v52 = vpop.permute.xlu1 %760  ;;  %v763_v27 = vpop.permute.xlu0 %762  ;;  %v758_v43 = vadd.f32 %v756_v25, %v742_v15  ;;  %v759_v56 = vadd.f32 %v757_v35, %v743_v50  ;;  %v937_v12 = vadd.f32 %v2142_v4, %v928_v28  ;;  %v415_v48 = vmin.f32 %v391_v51, 6.0 }
 0x20d   :  { %v764_v41 = vsel %vm585_vm3, %v761_v52, %v763_v27  ;;  %v765_v49 = vsel %vm585_vm3, %v763_v27, %v761_v52 }
 0x20e   :  { %v771_v63 = vmul.f32 %v2082_v61, %v764_v41  ;;  %v772_v31 = vmul.f32 %v2082_v61, %v765_v49  ;;  %v338_v61 = vadd.f32 %v1899_v46, %v2094_v45  ;;  %v939_v57 = vmul.f32 %v937_v12, %v2036_v47 }
 0x20f   :  { %v439_v1 = vmul.f32 %v415_v48, %v340_v54 }
 0x210   :  { %v776_v7 = vpop.permute.xlu1 %775  ;;  %v778_v14 = vpop.permute.xlu0 %777  ;;  %v773_v18 = vadd.f32 %v771_v63, %v758_v43  ;;  %v774_v13 = vadd.f32 %v772_v31, %v759_v56  ;;  %v366_v44 = vadd.f32 3.0, %v338_v61 }
 0x211   :  { %v779_v10 = vsel %vm616_vm4, %v776_v7, %v778_v14  ;;  %v780_v8 = vsel %vm616_vm4, %v778_v14, %v776_v7  ;;  %v504_v25 = vmul.f32 %v1978_v21, %v439_v1 }
 0x212   :  { %v786_v5 = vmul.f32 %v2110_v26, %v779_v10  ;;  %v787_v23 = vmul.f32 %v2110_v26, %v780_v8  ;;  %v938_v26 = vmul.f32 %v936_v0, %v2032_v53  ;;  %v1536_v10 = vld [vmem:[%s2612_s7 + $0xc8] sm:$0xff]  ;;  %v1535_v8 = vld [vmem:[%s2612_s7 + $0xc0] sm:$0xff] }
 0x214   :  { %v788_v38 = vadd.f32 %v786_v5, %v773_v18  ;;  %v789_v58 = vadd.f32 %v787_v23, %v774_v13  ;;  %v1538_v18 = vld [vmem:[%s2614_s8 + $0x10] sm:$0xff] }
 0x215   :  { %v1537_v13 = vld [vmem:[%s2612_s7 + $0xd0] sm:$0xff] }
 0x216   :  { %v796_v29 = vadd.f32 %v2134_v2, %v788_v38  ;;  %v797_v62 = vadd.f32 %v2134_v2, %v789_v58  ;;  %v390_v2 = vmax.f32 %v366_v44, 0.0 }
 0x218   :  { %v2334_v46 = vmul.f32 %v796_v29, %v2032_v53  ;;  %v2337_v19 = vmul.f32 %v797_v62, %v2036_v47  ;;  %v414_v3 = vmin.f32 %v390_v2, 6.0 }
 0x21a   :  { %v2340_v45 = vadd.f32 %v938_v26, %v2334_v46  ;;  %v2343_v4 = vadd.f32 %v939_v57, %v2337_v19  ;;  %v438_v59 = vmul.f32 %v414_v3, %v338_v61 }
 0x21c   :  { %961 = vrot.lane.b32.xlu0 %v2343_v4, %s1567_s6  ;;  %959 = vrot.lane.b32.xlu1 %v2340_v45, %s1567_s6  ;;  %v503_v6 = vmul.f32 %v1975_v37, %v438_v59 }
 0x220   :  { %976 = vrot.lane.b32.xlu0 %v2343_v4, %s1568_s0  ;;  %974 = vrot.lane.b32.xlu1 %v2340_v45, %s1568_s0 }
 0x221   :  { %v2353_v11 = vpop.permute.xlu1 %982  ;;  %v1135_v32 = vpop.permute.xlu0 %1134 }
 0x224   :  { %991 = vrot.lane.b32.xlu0 %v2343_v4, %s1569_s25  ;;  %989 = vrot.lane.b32.xlu1 %v2340_v45, %s1569_s25 }
 0x225   :  { %v2359_v34 = vpop.permute.xlu1 %997  ;;  %v1144_v40 = vpop.permute.xlu0 %1143 }
 0x226   :  { %v1146_v63 = vmul.f32 %v1144_v40, %v2204_v60  ;;  %v1147_v31 = vmul.f32 %v1144_v40, %v2212_v39  ;;  %v1531_v60 = vld [vmem:[%s2612_s7 + $0xa0] sm:$0xff]  ;;  %v1532_v39 = vld [vmem:[%s2612_s7 + $0xa8] sm:$0xff]  ;;  %v958_v40 = vmul.f32 %v2170_v24, %v2343_v4 }
 0x228   :  { %1006 = vrot.lane.b32.xlu0 %v2343_v4, %s1570_s26  ;;  %1004 = vrot.lane.b32.xlu1 %v2340_v45, %s1570_s26 }
 0x229   :  { %v2367_v35 = vpop.permute.xlu1 %1012  ;;  %v1153_v52 = vpop.permute.xlu0 %1152 }
 0x22a   :  { %v1155_v27 = vmul.f32 %v1153_v52, %v503_v6  ;;  %v1156_v55 = vmul.f32 %v1153_v52, %v504_v25  ;;  %v957_v6 = vmul.f32 %v2170_v24, %v2340_v45 }
 0x22c   :  { %1021 = vrot.lane.b32.xlu0 %v2343_v4, %s1565_s23  ;;  %1019 = vrot.lane.b32.xlu1 %v2340_v45, %s1565_s23 }
 0x22d   :  { %v2373_v9 = vpop.permute.xlu1 %1027  ;;  %v1127_v37 = vpop.permute.xlu0 %1126 }
 0x230   :  { %1036 = vrot.lane.b32.xlu0 %v2343_v4, %s1571_s1  ;;  %1034 = vrot.lane.b32.xlu1 %v2340_v45, %s1571_s1 }
 0x231   :  { %v1129_v21 = vpop.permute.xlu1 %1128  ;;  %v1168_v5 = vpop.permute.xlu0 %1167 }
 0x232   :  { %v1130_v41 = vsel %vm536_vm2, %v1127_v37, %v1129_v21  ;;  %v1131_v49 = vsel %vm536_vm2, %v1129_v21, %v1127_v37 }
 0x233   :  { %v1137_v15 = vmul.f32 %v1135_v32, %v1130_v41  ;;  %v1138_v50 = vmul.f32 %v1135_v32, %v1131_v49 }
 0x234   :  { %1051 = vrot.lane.b32.xlu0 %v2343_v4, %s1564_s3  ;;  %1049 = vrot.lane.b32.xlu1 %v2340_v45, %s1564_s3 }
 0x235   :  { %v1139_v20 = vadd.f32 %v1137_v15, %v2190_v33  ;;  %v1140_v28 = vadd.f32 %v1138_v50, %v2192_v22  ;;  %v1529_v33 = vld [vmem:[%s2612_s7 + $0x90] sm:$0xff]  ;;  %v2433_v23 = vpop.permute.xlu1 %1042  ;;  %v2435_v61 = vpop.permute.xlu0 %1182 }
 0x236   :  { %v1533_v22 = vld [vmem:[%s2612_s7 + $0xb0] sm:$0xff] }
 0x237   :  { %v1148_v43 = vadd.f32 %v1146_v63, %v1139_v20  ;;  %v1149_v56 = vadd.f32 %v1147_v31, %v1140_v28 }
 0x238   :  { %1066 = vrot.lane.b32.xlu0 %v2343_v4, %s1566_s24  ;;  %1064 = vrot.lane.b32.xlu1 %v2340_v45, %s1566_s24 }
 0x239   :  { %v2395_v7 = vadd.f32 %v1155_v27, %v1148_v43  ;;  %v2397_v14 = vadd.f32 %v1156_v55, %v1149_v56  ;;  %v2437_v54 = vpop.permute.xlu1 %1057  ;;  %v2439_v0 = vpop.permute.xlu0 %1197 }
 0x23c   :  { %1206 = vrot.lane.b32.xlu0 %v2176_v17, %s1566_s24  ;;  %1204 = vrot.lane.b32.xlu1 %v2162_v42, %s1566_s24  ;;  %v1530_v17 = vld [vmem:[%s2612_s7 + $0x98] sm:$0xff] }
 0x23d   :  { %v1534_v42 = vld [vmem:[%s2612_s7 + $0xb8] sm:$0xff]  ;;  %v2441_v12 = vpop.permute.xlu1 %1072  ;;  %v1160_v38 = vpop.permute.xlu0 %1159 }
 0x240   :  { %1257 = vperm.xlu0 %1556, %v1529_v33   ;;  %1244 = vperm.xlu1 %1557, %v1533_v22  }
 0x241   :  { %v1162_v58 = vpop.permute.xlu1 %1161  ;;  %v2443_v29 = vpop.permute.xlu0 %1212 }
 0x244   :  { %1287 = vperm.xlu0 %1556, %v1531_v60   ;;  %1272 = vperm.xlu1 %1557, %v1530_v17  }
 0x245   :  { %v1175_v62 = vpop.permute.xlu1 %1174  ;;  %v1177_v44 = vpop.permute.xlu0 %1176 }
 0x248   :  { %1317 = vperm.xlu0 %1556, %v1534_v42   ;;  %1302 = vperm.xlu1 %1557, %v1532_v39   ;;  %v1163_v42 = vsel %vm536_vm2, %v1160_v38, %v1162_v58  ;;  %v1164_v39 = vsel %vm536_vm2, %v1162_v58, %v1160_v38  ;;  %v1178_v38 = vsel %vm585_vm3, %v1175_v62, %v1177_v44 }
 0x249   :  { %v2445_v16 = vpop.permute.xlu1 %1083  ;;  %v1190_v26 = vpop.permute.xlu0 %1189 }
 0x24c   :  { %1347 = vperm.xlu0 %1556, %v1536_v10   ;;  %1332 = vperm.xlu1 %1557, %v1535_v8  }
 0x24d   :  { %v1192_v57 = vpop.permute.xlu1 %1191  ;;  %v2447_v2 = vpop.permute.xlu0 %1223 }
 0x250   :  { %1373 = vperm.xlu0 %1556, %v1538_v18   ;;  %1362 = vperm.xlu1 %1557, %v1537_v13  }
 0x28e   :  { %v962_v51 = vpop.permute.xlu0 %961  ;;  %v960_v3 = vpop.permute.xlu1 %959 }
 0x28f   :  { %v963_v48 = vsel %vm669_vm5, %v960_v3, %v962_v51  ;;  %v964_v32 = vsel %vm669_vm5, %v962_v51, %v960_v3 }
 0x290   :  { %v970_v59 = vmul.f32 %v2166_v30, %v964_v32  ;;  %v971_v1 = vmul.f32 %v2166_v30, %v963_v48 }
 0x292   :  { %v977_v25 = vpop.permute.xlu0 %976  ;;  %v975_v52 = vpop.permute.xlu1 %974  ;;  %v972_v37 = vadd.f32 %v970_v59, %v957_v6  ;;  %v973_v21 = vadd.f32 %v971_v1, %v958_v40  ;;  %v1170_v59 = vmul.f32 %v1168_v5, %v1163_v42  ;;  %v1171_v1 = vmul.f32 %v1168_v5, %v1164_v39 }
 0x293   :  { %v978_v27 = vsel %vm685_vm6, %v975_v52, %v977_v25  ;;  %v979_v55 = vsel %vm685_vm6, %v977_v25, %v975_v52 }
 0x294   :  { %v985_v41 = vmul.f32 %v2353_v11, %v979_v55  ;;  %v986_v30 = vmul.f32 %v2353_v11, %v978_v27  ;;  %v1193_v55 = vsel %vm585_vm3, %v1190_v26, %v1192_v57 }
 0x296   :  { %v987_v49 = vadd.f32 %v985_v41, %v972_v37  ;;  %v988_v15 = vadd.f32 %v986_v30, %v973_v21  ;;  %v992_v4 = vpop.permute.xlu0 %991  ;;  %v990_v50 = vpop.permute.xlu1 %989  ;;  %v1185_v41 = vmul.f32 %v2435_v61, %v1178_v38 }
 0x297   :  { %v994_v24 = vsel %vm701_vm7, %v992_v4, %v990_v50  ;;  %v993_v28 = vsel %vm701_vm7, %v990_v50, %v992_v4 }
 0x298   :  { %v1000_v45 = vmul.f32 %v2359_v34, %v994_v24  ;;  %v1001_v22 = vmul.f32 %v2359_v34, %v993_v28  ;;  %v1200_v24 = vmul.f32 %v2439_v0, %v1193_v55 }
 0x29a   :  { %v1002_v63 = vadd.f32 %v1000_v45, %v987_v49  ;;  %v1007_v31 = vpop.permute.xlu0 %1006  ;;  %v1005_v20 = vpop.permute.xlu1 %1004  ;;  %v1003_v3 = vadd.f32 %v1001_v22, %v988_v15  ;;  %v1172_v49 = vadd.f32 %v1170_v59, %v2395_v7 }
 0x29b   :  { %v1008_v11 = vsel %vm717_vm8, %v1005_v20, %v1007_v31  ;;  %v1009_v33 = vsel %vm717_vm8, %v1007_v31, %v1005_v20 }
 0x29c   :  { %v1015_v10 = vmul.f32 %v2367_v35, %v1009_v33  ;;  %v1016_v8 = vmul.f32 %v2367_v35, %v1008_v11  ;;  %v1179_v35 = vsel %vm585_vm3, %v1177_v44, %v1175_v62  ;;  %v1187_v20 = vadd.f32 %v1185_v41, %v1172_v49 }
 0x29d   :  { %v1186_v30 = vmul.f32 %v2435_v61, %v1179_v35 }
 0x29e   :  { %v1022_v43 = vpop.permute.xlu0 %1021  ;;  %v1020_v56 = vpop.permute.xlu1 %1019  ;;  %v1017_v58 = vadd.f32 %v1015_v10, %v1002_v63  ;;  %v1018_v40 = vadd.f32 %v1016_v8, %v1003_v3 }
 0x29f   :  { %v1023_v60 = vsel %vm536_vm2, %v1020_v56, %v1022_v43  ;;  %v1024_v17 = vsel %vm536_vm2, %v1022_v43, %v1020_v56  ;;  %v801_v43 = vadd.f32 3.0, %v2337_v19  ;;  %v800_v56 = vadd.f32 3.0, %v2334_v46 }
 0x2a0   :  { %v1030_v48 = vmul.f32 %v2373_v9, %v1023_v60  ;;  %v1031_v32 = vmul.f32 %v2373_v9, %v1024_v17  ;;  %v1194_v9 = vsel %vm585_vm3, %v1192_v57, %v1190_v26  ;;  %v1173_v26 = vadd.f32 %v1171_v1, %v2397_v14 }
 0x2a1   :  { %v1201_v45 = vmul.f32 %v2439_v0, %v1194_v9  ;;  %v1202_v60 = vadd.f32 %v1200_v24, %v1187_v20 }
 0x2a2   :  { %v1037_v18 = vpop.permute.xlu0 %1036  ;;  %v1035_v13 = vpop.permute.xlu1 %1034  ;;  %v1032_v44 = vadd.f32 %v1030_v48, %v1017_v58  ;;  %v1033_v37 = vadd.f32 %v1031_v32, %v1018_v40  ;;  %v1188_v28 = vadd.f32 %v1186_v30, %v1173_v26 }
 0x2a3   :  { %v1038_v34 = vsel %vm748_vm9, %v1035_v13, %v1037_v18  ;;  %v1039_v51 = vsel %vm748_vm9, %v1037_v18, %v1035_v13  ;;  %v803_v13 = vmax.f32 %v801_v43, 0.0 }
 0x2a4   :  { %v1045_v6 = vmul.f32 %v2433_v23, %v1038_v34  ;;  %v1046_v25 = vmul.f32 %v2433_v23, %v1039_v51  ;;  %v1203_v17 = vadd.f32 %v1201_v45, %v1188_v28  ;;  %v802_v34 = vmax.f32 %v800_v56, 0.0 }
 0x2a5   :  { %v805_v58 = vmin.f32 %v803_v13, 6.0 }
 0x2a6   :  { %v1052_v52 = vpop.permute.xlu0 %1051  ;;  %v1050_v27 = vpop.permute.xlu1 %1049  ;;  %v1047_v57 = vadd.f32 %v1045_v6, %v1032_v44  ;;  %v1048_v15 = vadd.f32 %v1046_v25, %v1033_v37 }
 0x2a7   :  { %v1053_v5 = vsel %vm585_vm3, %v1050_v27, %v1052_v52  ;;  %v1054_v62 = vsel %vm585_vm3, %v1052_v52, %v1050_v27 }
 0x2a8   :  { %v1060_v21 = vmul.f32 %v2437_v54, %v1053_v5  ;;  %v1061_v23 = vmul.f32 %v2437_v54, %v1054_v62  ;;  %v807_v5 = vmul.f32 %v805_v58, %v2337_v19  ;;  %v1572_v19 = vmov 0.0  }
 0x2a9   :  { %1471 = vmatprep.mubr.f32.mxu0 %v1572_v19 }
 0x2aa   :  { %v1067_v4 = vpop.permute.xlu0 %1066  ;;  %v1065_v50 = vpop.permute.xlu1 %1064  ;;  %v1062_v31 = vadd.f32 %v1060_v21, %v1047_v57  ;;  %v1063_v61 = vadd.f32 %v1061_v23, %v1048_v15 }
 0x2ab   :  { %v1068_v63 = vsel %vm616_vm4, %v1065_v50, %v1067_v4  ;;  %v1069_v54 = vsel %vm616_vm4, %v1067_v4, %v1065_v50 }
 0x2ac   :  { %v1075_v7 = vmul.f32 %v2441_v12, %v1068_v63  ;;  %v1076_v14 = vmul.f32 %v2441_v12, %v1069_v54 }
 0x2ae   :  { %v1077_v11 = vadd.f32 %v1075_v7, %v1062_v31  ;;  %v1078_v0 = vadd.f32 %v1076_v14, %v1063_v61  ;;  %v1207_v33 = vpop.permute.xlu0 %1206  ;;  %v1205_v22 = vpop.permute.xlu1 %1204 }
 0x2af   :  { %v1208_v42 = vsel %vm616_vm4, %v1205_v22, %v1207_v33  ;;  %v1209_v39 = vsel %vm616_vm4, %v1207_v33, %v1205_v22 }
 0x2b0   :  { %v1086_v12 = vadd.f32 %v2445_v16, %v1077_v11  ;;  %v1087_v10 = vadd.f32 %v2445_v16, %v1078_v0  ;;  %v1215_v8 = vmul.f32 %v2443_v29, %v1208_v42  ;;  %v1216_v18 = vmul.f32 %v2443_v29, %v1209_v39 }
 0x2b1   :  { %v804_v16 = vmin.f32 %v802_v34, 6.0 }
 0x2b2   :  { %v1088_v51 = vmul.f32 %v1086_v12, %v2032_v53  ;;  %v1089_v3 = vmul.f32 %v1087_v10, %v2036_v47  ;;  %v1217_v48 = vadd.f32 %v1215_v8, %v1202_v60  ;;  %v1218_v32 = vadd.f32 %v1216_v18, %v1203_v17 }
 0x2b3   :  { %v806_v62 = vmul.f32 %v804_v16, %v2334_v46  ;;  %v1397_v46 = vld [vmem:[%s2616_s10] sm:$0xff] }
 0x2b4   :  { %v1226_v59 = vadd.f32 %v2447_v2, %v1217_v48  ;;  %v1227_v1 = vadd.f32 %v2447_v2, %v1218_v32  ;;  %v1091_v38 = vadd.f32 3.0, %v1089_v3  ;;  %v1090_v35 = vadd.f32 3.0, %v1088_v51 }
 0x2b6   :  { %v1228_v40 = vmul.f32 %v1226_v59, %v2032_v53  ;;  %v1229_v29 = vmul.f32 %v1227_v1, %v2036_v47  ;;  %v1093_v6 = vmax.f32 %v1091_v38, 0.0  ;;  %v1092_v25 = vmax.f32 %v1090_v35, 0.0 }
 0x2b8   :  { %v1230_v52 = vadd.f32 %v1228_v40, %v1088_v51  ;;  %v1231_v27 = vadd.f32 %v1229_v29, %v1089_v3  ;;  %v1095_v55 = vmin.f32 %v1093_v6, 6.0  ;;  %v1094_v9 = vmin.f32 %v1092_v25, 6.0 }
 0x2ba   :  { %1251 = vrot.lane.b32.xlu0 %v1231_v27, %s1567_s6  ;;  %1249 = vrot.lane.b32.xlu1 %v1230_v52, %s1567_s6  ;;  %v1097_v2 = vmul.f32 %v1095_v55, %v1089_v3  ;;  %v1096_v44 = vmul.f32 %v1094_v9, %v1088_v51 }
 0x2bc   :  { %v1541_v37 = vpack.c.bf16 %v1097_v2, %v807_v5  ;;  %v1543_v21 = vpack.c.bf16 %v1096_v44, %v806_v62 }
 0x2be   :  { %1542 = vmatprep.subr.bf16.mxu0 %v1541_v37  ;;  %1264 = vrot.lane.b32.xlu0 %v1230_v52, %s1568_s0 }
 0x2bf   :  { %1266 = vrot.lane.b32.xlu1 %v1231_v27, %s1568_s0  ;;  %1544 = vmatpush1.bf16.msra.mxu0 %v1543_v21  ;;  %v1258_v23 = vpop.permute.xlu0 %1257  ;;  %v1245_v41 = vpop.permute.xlu1 %1244 }
 0x2c0   :  { %v1247_v42 = vmul.f32 %v1245_v41, %v1230_v52  ;;  %v1248_v39 = vmul.f32 %v1245_v41, %v1231_v27 }
 0x2c2   :  { %1281 = vrot.lane.b32.xlu0 %v1231_v27, %s1569_s25 }
 0x2c3   :  { %1279 = vrot.lane.b32.xlu1 %v1230_v52, %s1569_s25  ;;  %v1288_v30 = vpop.permute.xlu0 %1287  ;;  %v1273_v49 = vpop.permute.xlu1 %1272 }
 0x2c6   :  { %1294 = vrot.lane.b32.xlu0 %v1230_v52, %s1570_s26 }
 0x2c7   :  { %1296 = vrot.lane.b32.xlu1 %v1231_v27, %s1570_s26  ;;  %v1318_v26 = vpop.permute.xlu0 %1317  ;;  %v1303_v57 = vpop.permute.xlu1 %1302 }
 0x2ca   :  { %1311 = vrot.lane.b32.xlu0 %v1231_v27, %s1565_s23 }
 0x2cb   :  { %1309 = vrot.lane.b32.xlu1 %v1230_v52, %s1565_s23  ;;  %v1348_v15 = vpop.permute.xlu0 %1347  ;;  %v1333_v4 = vpop.permute.xlu1 %1332 }
 0x2ce   :  { %1324 = vrot.lane.b32.xlu0 %v1230_v52, %s1571_s1 }
 0x2cf   :  { %1326 = vrot.lane.b32.xlu1 %v1231_v27, %s1571_s1  ;;  %v2556_v50 = vpop.permute.xlu0 %1373  ;;  %v2558_v24 = vpop.permute.xlu1 %1362 }
 0x2d2   :  { %1339 = vrot.lane.b32.xlu0 %v1230_v52, %s1564_s3 }
 0x2d3   :  { %1341 = vrot.lane.b32.xlu1 %v1231_v27, %s1564_s3 }
 0x2d6   :  { %1356 = vrot.lane.b32.xlu0 %v1231_v27, %s1566_s24 }
 0x2d7   :  { %1354 = vrot.lane.b32.xlu1 %v1230_v52, %s1566_s24 }
 0x2db   :  { %1400 = vperm.xlu1 %1557, %v1397_v46  }
 0x32c   :  { %v1252_v45 = vpop.permute.xlu0 %1251  ;;  %v1250_v63 = vpop.permute.xlu1 %1249 }
 0x32d   :  { %v1253_v14 = vsel %vm669_vm5, %v1250_v63, %v1252_v45  ;;  %v1254_v20 = vsel %vm669_vm5, %v1252_v45, %v1250_v63 }
 0x32e   :  { %v1260_v0 = vmul.f32 %v1258_v23, %v1254_v20  ;;  %v1261_v33 = vmul.f32 %v1258_v23, %v1253_v14 }
 0x330   :  { %v1265_v54 = vpop.permute.xlu0 %1264  ;;  %v1262_v34 = vadd.f32 %v1260_v0, %v1247_v42  ;;  %v1263_v51 = vadd.f32 %v1261_v33, %v1248_v39 }
 0x331   :  { %v1267_v31 = vpop.permute.xlu1 %1266 }
 0x332   :  { %v1268_v56 = vsel %vm685_vm6, %v1265_v54, %v1267_v31  ;;  %v1269_v11 = vsel %vm685_vm6, %v1267_v31, %v1265_v54 }
 0x333   :  { %v1275_v12 = vmul.f32 %v1273_v49, %v1269_v11  ;;  %v1276_v10 = vmul.f32 %v1273_v49, %v1268_v56 }
 0x334   :  { %v1282_v61 = vpop.permute.xlu0 %1281 }
 0x335   :  { %v1280_v7 = vpop.permute.xlu1 %1279  ;;  %v1277_v38 = vadd.f32 %v1275_v12, %v1262_v34  ;;  %v1278_v35 = vadd.f32 %v1276_v10, %v1263_v51 }
 0x336   :  { %v1283_v22 = vsel %vm701_vm7, %v1280_v7, %v1282_v61  ;;  %v1284_v60 = vsel %vm701_vm7, %v1282_v61, %v1280_v7 }
 0x337   :  { %v1290_v3 = vmul.f32 %v1288_v30, %v1284_v60  ;;  %v1291_v48 = vmul.f32 %v1288_v30, %v1283_v22 }
 0x338   :  { %v1295_v28 = vpop.permute.xlu0 %1294 }
 0x339   :  { %v1297_v43 = vpop.permute.xlu1 %1296  ;;  %v1292_v25 = vadd.f32 %v1290_v3, %v1277_v38  ;;  %v1293_v52 = vadd.f32 %v1291_v48, %v1278_v35 }
 0x33a   :  { %v1298_v18 = vsel %vm717_vm8, %v1295_v28, %v1297_v43  ;;  %v1299_v13 = vsel %vm717_vm8, %v1297_v43, %v1295_v28 }
 0x33b   :  { %v1305_v58 = vmul.f32 %v1303_v57, %v1299_v13  ;;  %v1306_v16 = vmul.f32 %v1303_v57, %v1298_v18 }
 0x33c   :  { %v1312_v17 = vpop.permute.xlu0 %1311 }
 0x33d   :  { %v1310_v8 = vpop.permute.xlu1 %1309  ;;  %v1307_v5 = vadd.f32 %v1305_v58, %v1292_v25  ;;  %v1308_v2 = vadd.f32 %v1306_v16, %v1293_v52 }
 0x33e   :  { %v1313_v32 = vsel %vm536_vm2, %v1310_v8, %v1312_v17  ;;  %v1314_v59 = vsel %vm536_vm2, %v1312_v17, %v1310_v8 }
 0x33f   :  { %v1320_v27 = vmul.f32 %v1318_v26, %v1313_v32  ;;  %v1321_v55 = vmul.f32 %v1318_v26, %v1314_v59 }
 0x340   :  { %v1325_v1 = vpop.permute.xlu0 %1324 }
 0x341   :  { %v1327_v40 = vpop.permute.xlu1 %1326  ;;  %v1322_v19 = vadd.f32 %v1320_v27, %v1307_v5  ;;  %v1323_v23 = vadd.f32 %v1321_v55, %v1308_v2 }
 0x342   :  { %v1328_v29 = vsel %vm748_vm9, %v1325_v1, %v1327_v40  ;;  %v1329_v6 = vsel %vm748_vm9, %v1327_v40, %v1325_v1 }
 0x343   :  { %v1335_v62 = vmul.f32 %v1333_v4, %v1328_v29  ;;  %v1336_v44 = vmul.f32 %v1333_v4, %v1329_v6 }
 0x344   :  { %v1340_v9 = vpop.permute.xlu0 %1339 }
 0x345   :  { %v1342_v37 = vpop.permute.xlu1 %1341  ;;  %v1337_v57 = vadd.f32 %v1335_v62, %v1322_v19  ;;  %v1338_v45 = vadd.f32 %v1336_v44, %v1323_v23 }
 0x346   :  { %v1343_v21 = vsel %vm585_vm3, %v1340_v9, %v1342_v37  ;;  %v1344_v46 = vsel %vm585_vm3, %v1342_v37, %v1340_v9 }
 0x347   :  { %v1350_v41 = vmul.f32 %v1348_v15, %v1343_v21  ;;  %v1351_v30 = vmul.f32 %v1348_v15, %v1344_v46 }
 0x348   :  { %v1357_v49 = vpop.permute.xlu0 %1356 }
 0x349   :  { %v1355_v26 = vpop.permute.xlu1 %1354  ;;  %v1352_v54 = vadd.f32 %v1350_v41, %v1337_v57  ;;  %v1353_v31 = vadd.f32 %v1351_v30, %v1338_v45 }
 0x34a   :  { %v1358_v63 = vsel %vm616_vm4, %v1355_v26, %v1357_v49  ;;  %v1359_v4 = vsel %vm616_vm4, %v1357_v49, %v1355_v26 }
 0x34b   :  { %v1365_v61 = vmul.f32 %v2558_v24, %v1358_v63  ;;  %v1366_v7 = vmul.f32 %v2558_v24, %v1359_v4  ;;  %v1390_v24 = vld [vmem:[%s2617_s9] sm:$0xff] }
 0x34d   :  { %v1367_v14 = vadd.f32 %v1365_v61, %v1352_v54  ;;  %v1368_v20 = vadd.f32 %v1366_v7, %v1353_v31 }
 0x34f   :  { %v1376_v15 = vadd.f32 %v2556_v50, %v1367_v14  ;;  %v1377_v28 = vadd.f32 %v2556_v50, %v1368_v20 }
 0x351   :  { %v1378_v43 = vmul.f32 %v1376_v15, %v2032_v53  ;;  %v1379_v56 = vmul.f32 %v1377_v28, %v2036_v47 }
 0x353   :  { %v1381_v11 = vadd.f32 3.0, %v1379_v56  ;;  %v1380_v0 = vadd.f32 3.0, %v1378_v43 }
 0x355   :  { %v1383_v36 = vmax.f32 %v1381_v11, 0.0  ;;  %v1382_v33 = vmax.f32 %v1380_v0, 0.0 }
 0x357   :  { %v1385_v22 = vmin.f32 %v1383_v36, 6.0  ;;  %v1384_v60 = vmin.f32 %v1382_v33, 6.0 }
 0x359   :  { %v1387_v17 = vmul.f32 %v1385_v22, %v1379_v56  ;;  %v1386_v42 = vmul.f32 %v1384_v60, %v1378_v43 }
 0x35a   :  { %v1401_v50 = vpop.permute.xlu1 %1400 }
 0x35b   :  { %1411 = vmatprep.subr.mxu0 %v1387_v17 }
 0x35c   :  { %1412 = vmatpush1.msra.mxu0 %v1386_v42 }
 0x35d   :  { %1539 = vmatmul.mubr.msk.f32.vlgmr.msra.gmra.mrb[16].mxu0 %vm1403_vm10, %v1390_v24 }
 0x430   :  { %v1473_v53 = vpop.f32.mrb[16].mxu0 }
 0x431   :  { %v1474_v39 = vadd.f32 %v1473_v53, %v1401_v50  ;;  %v1475_v47 = vpop.f32.mrb[17].mxu0 }
 0x432   :  { %v1476_v12 = vadd.f32 %v1475_v47, %v1401_v50 }
 0x433   :  { %1478 = vst [vmem:[%s2618_s11] sm:$0xff] %v1474_v39 }
 0x434   :  { %1540 = vst [vmem:[%s2618_s11 + $0x8] sm:$0xff] %v1476_v12 }

</bundles_post_ra>
